<compile_context>
chip_gen: v7x
topology: tpu7x:2x2x1
jax: 0.10.0
libtpu: 0.0.40
codegen_flags: <defaults>
</compile_context>

<pallas_src>
import math

import jax
import jax.numpy as jnp
from jax.experimental import pallas as pl
from jax.experimental.pallas import tpu as pltpu


def _round_up(x: int, m: int) -> int:
    return ((x + m - 1) // m) * m


def _make_gcn_kernel(apply_weight_in_finalize: bool):
    """Returns the tiled GCN kernel.

    Grid = (row tiles i, neighbor tiles k).  Per step:
        acc += A[i, k] @ (feat[k] * norm[k])        (bf16 MXU, f32 accumulate)
    Finalize (k == last):
        apply_weight_in_finalize:  out = tanh((acc * norm[i]) @ W^T + b)
        else (feat was pre-projected to F_out):  out = tanh(acc * norm[i] + b)
    """
    if apply_weight_in_finalize:

        def kernel(adj_ref, nsrc_ref, ndst_ref, feat_ref, wt_ref, b_ref,
                   o_ref, acc_ref):
            k = pl.program_id(1)

            @pl.when(k == 0)
            def _init():
                acc_ref[...] = jnp.zeros_like(acc_ref)

            # gcn_msg: scale source features by source norm (f32 on the VPU),
            # cast once to bf16 for the MXU.
            msg = (feat_ref[...] * nsrc_ref[...]).astype(jnp.bfloat16)
            acc_ref[...] += jnp.dot(adj_ref[...], msg,
                                    preferred_element_type=jnp.float32)

            @pl.when(k == pl.num_programs(1) - 1)
            def _finalize():
                # gcn_reduce: scale by destination norm, then Linear + Tanh.
                agg = acc_ref[...] * ndst_ref[...]
                h = jnp.dot(agg, wt_ref[...],
                            preferred_element_type=jnp.float32) + b_ref[...]
                o_ref[...] = jnp.tanh(h).astype(o_ref.dtype)

        return kernel

    else:

        def kernel(adj_ref, nsrc_ref, ndst_ref, feat_ref, b_ref,
                   o_ref, acc_ref):
            k = pl.program_id(1)

            @pl.when(k == 0)
            def _init():
                acc_ref[...] = jnp.zeros_like(acc_ref)

            msg = (feat_ref[...] * nsrc_ref[...]).astype(jnp.bfloat16)
            acc_ref[...] += jnp.dot(adj_ref[...], msg,
                                    preferred_element_type=jnp.float32)

            @pl.when(k == pl.num_programs(1) - 1)
            def _finalize():
                h = acc_ref[...] * ndst_ref[...] + b_ref[...]
                o_ref[...] = jnp.tanh(h).astype(o_ref.dtype)

        return kernel


def gcn_layer(adj, norm, x, weight, bias, *, project_first=None,
              tm: int = 256, tk: int = 512):
    """GCN layer forward.

    adj:    [N, N] float (adj[i, j] = 1 iff edge j -> i)
    norm:   [N]    float
    x:      [N, F_in]
    weight: [F_out, F_in]   (nn.Linear weight)
    bias:   [F_out]
    Returns [N, F_out] float32.
    """
    n, f_in = x.shape
    f_out = weight.shape[0]
    assert weight.shape[1] == f_in

    # Associativity: diag(n) A diag(n) X W^T == diag(n) A (diag(n) (X W^T)).
    # Run the O(N^2) aggregation at width min(F_in, F_out).
    if project_first is None:
        project_first = f_out < f_in

    w_t = weight.T.astype(jnp.float32)                     # [F_in, F_out]
    b_row = bias.reshape(1, f_out).astype(jnp.float32)     # [1, F_out]

    feat = x.astype(jnp.float32)
    if project_first:
        # Dense projection (O(N*F_in*F_out)) handled by plain XLA; the Pallas
        # kernel keeps the dominant O(N^2) aggregation.
        feat = jnp.dot(feat, w_t)                          # [N, F_out]
        f_mid = f_out
    else:
        f_mid = f_in

    # Pad nodes so both tile sizes divide N (padded rows/cols have zero
    # adjacency, zero norm, zero features -> contribute nothing; sliced off).
    n_pad = _round_up(max(n, 1), (tm * tk) // math.gcd(tm, tk))
    pad_n = n_pad - n

    adj_p = jnp.pad(adj.astype(jnp.bfloat16), ((0, pad_n), (0, pad_n)))
    norm_p = jnp.pad(norm.astype(jnp.float32).reshape(n, 1), ((0, pad_n), (0, 0)))
    feat_p = jnp.pad(feat, ((0, pad_n), (0, 0)))

    grid = (n_pad // tm, n_pad // tk)

    in_specs = [
        pl.BlockSpec((tm, tk), lambda i, k: (i, k)),       # adjacency tile
        pl.BlockSpec((tk, 1), lambda i, k: (k, 0)),        # source-node norm
        pl.BlockSpec((tm, 1), lambda i, k: (i, 0)),        # dest-node norm
        pl.BlockSpec((tk, f_mid), lambda i, k: (k, 0)),    # (projected) features
    ]
    operands = [adj_p, norm_p, norm_p, feat_p]
    if not project_first:
        in_specs.append(pl.BlockSpec((f_in, f_out), lambda i, k: (0, 0)))  # W^T
        operands.append(w_t)
    in_specs.append(pl.BlockSpec((1, f_out), lambda i, k: (0, 0)))         # bias
    operands.append(b_row)

    flops = 2 * n_pad * n_pad * f_mid
    if not project_first:
        flops += 2 * n_pad * f_in * f_out
    bytes_accessed = (2 * n_pad * n_pad                       # bf16 adjacency
                      + 4 * n_pad * f_mid * (n_pad // tm)     # feat re-read per row tile
                      + 4 * n_pad * f_out)                    # output
    cost = pl.CostEstimate(flops=int(flops),
                           transcendentals=int(n_pad * f_out),
                           bytes_accessed=int(bytes_accessed))

    out_p = pl.pallas_call(
        _make_gcn_kernel(apply_weight_in_finalize=not project_first),
        out_shape=jax.ShapeDtypeStruct((n_pad, f_out), jnp.float32),
        grid_spec=pltpu.PrefetchScalarGridSpec(
            num_scalar_prefetch=0,
            grid=grid,
            in_specs=in_specs,
            out_specs=pl.BlockSpec((tm, f_out), lambda i, k: (i, 0)),
            scratch_shapes=[pltpu.VMEM((tm, f_mid), jnp.float32)],
        ),
        compiler_params=pltpu.CompilerParams(
            dimension_semantics=("parallel", "arbitrary")),
        cost_estimate=cost,
    )(*operands)

    return out_p[:n]


if __name__ == "__main__":
    key = jax.random.PRNGKey(0)
    N, IN_FEATS, OUT_FEATS = 8, 16, 32

    # Deterministic synthetic graph: ring with both directions + self loops.
    adj = jnp.zeros((N, N), dtype=jnp.float32)
    idx = jnp.arange(N)
    adj = adj.at[idx, idx].set(1.0)                    # self loops
    adj = adj.at[idx, (idx + 1) % N].set(1.0)          # edge (i+1) -> i
    adj = adj.at[idx, (idx - 1) % N].set(1.0)          # edge (i-1) -> i
    in_deg = adj.sum(axis=1)
    norm = 1.0 / jnp.sqrt(in_deg)                      # ndata['norm']

    k_x, k_w, k_b = jax.random.split(key, 3)
    x = jax.random.normal(k_x, (N, IN_FEATS), dtype=jnp.float32)

    # nn.Linear-style deterministic init: U(-1/sqrt(in), 1/sqrt(in)).
    bound = 1.0 / (IN_FEATS ** 0.5)
    weight = jax.random.uniform(k_w, (OUT_FEATS, IN_FEATS),
                                minval=-bound, maxval=bound, dtype=jnp.float32)
    bias = jax.random.uniform(k_b, (OUT_FEATS,),
                              minval=-bound, maxval=bound, dtype=jnp.float32)

    # Pure-JAX f32 reference of the same semantics.
    ref = jnp.tanh((adj @ (x * norm[:, None])) * norm[:, None] @ weight.T + bias)

    # Default ordering (here F_in <= F_out -> aggregate first, project in finalize).
    out = jax.block_until_ready(gcn_layer(adj, norm, x, weight, bias))
    assert out.shape == (N, OUT_FEATS)
    assert jnp.allclose(out, ref, atol=2e-2, rtol=2e-2), \
        float(jnp.max(jnp.abs(out - ref)))

    # Also exercise the project-first path (used when F_out < F_in).
    out_pf = jax.block_until_ready(
        gcn_layer(adj, norm, x, weight, bias, project_first=True))
    assert out_pf.shape == (N, OUT_FEATS)
    assert jnp.allclose(out_pf, ref, atol=2e-2, rtol=2e-2), \
        float(jnp.max(jnp.abs(out_pf - ref)))

    print("KERNEL_OK")
</pallas_src>

<mosaic_0001>
module attributes {stable_mosaic.version = 11 : i64} {
  func.func @kernel(%arg0: i32, %arg1: i32, %arg2: memref<256x512xbf16, #tpu.memory_space<vmem>>, %arg3: memref<512x1xf32, #tpu.memory_space<vmem>>, %arg4: memref<256x1xf32, #tpu.memory_space<vmem>>, %arg5: memref<512x16xf32, #tpu.memory_space<vmem>>, %arg6: memref<16x32xf32, #tpu.memory_space<vmem>>, %arg7: memref<1x32xf32, #tpu.memory_space<vmem>>, %arg8: memref<256x32xf32, #tpu.memory_space<vmem>>, %arg9: memref<256x16xf32, #tpu.memory_space<vmem>>) attributes {dimension_semantics = [#tpu.dimension_semantics<parallel>, #tpu.dimension_semantics<arbitrary>], iteration_bounds = array<i64: 2, 1>, scalar_prefetch = 0 : i64, scratch_operands = 1 : i64, tpu.core_type = #tpu.core_type<tc>, window_params = [{transform_indices = @transform_0, window_bounds = array<i64: 256, 512>}, {transform_indices = @transform_1, window_bounds = array<i64: 512, 1>}, {transform_indices = @transform_2, window_bounds = array<i64: 256, 1>}, {transform_indices = @transform_3, window_bounds = array<i64: 512, 16>}, {pipeline_mode = #tpu.pipeline_mode<synchronous>, transform_indices = @transform_4, window_bounds = array<i64: 16, 32>}, {pipeline_mode = #tpu.pipeline_mode<synchronous>, transform_indices = @transform_5, window_bounds = array<i64: 1, 32>}, {transform_indices = @transform_6, window_bounds = array<i64: 256, 32>}]} {
    %c0_i32 = arith.constant 0 : i32
    %0 = arith.cmpi eq, %arg1, %c0_i32 : i32
    %1 = arith.extui %0 : i1 to i32
    %c0_i32_0 = arith.constant 0 : i32
    %2 = arith.cmpi ne, %1, %c0_i32_0 : i32
    scf.if %2 {
      %cst_12 = arith.constant 0.000000e+00 : f32
      %16 = vector.broadcast %cst_12 : f32 to vector<256x16xf32>
      %c0_13 = arith.constant 0 : index
      %c0_14 = arith.constant 0 : index
      %17 = vector.load %arg9[%c0_13, %c0_14] : memref<256x16xf32, #tpu.memory_space<vmem>>, vector<256x16xf32>
      tpu.vector_store %arg9[%c0_13, %c0_14], %16 {strides = array<i32>} : memref<256x16xf32, #tpu.memory_space<vmem>>, vector<256x16xf32>,
    } else {
    }
    %c0 = arith.constant 0 : index
    %c0_1 = arith.constant 0 : index
    %3 = vector.load %arg5[%c0, %c0_1] : memref<512x16xf32, #tpu.memory_space<vmem>>, vector<512x16xf32>
    %c0_2 = arith.constant 0 : index
    %c0_3 = arith.constant 0 : index
    %4 = vector.load %arg3[%c0_2, %c0_3] : memref<512x1xf32, #tpu.memory_space<vmem>>, vector<512x1xf32>
    %5 = vector.broadcast %4 : vector<512x1xf32> to vector<512x16xf32>
    %6 = arith.mulf %3, %5 : vector<512x16xf32>
    %7 = arith.truncf %6 : vector<512x16xf32> to vector<512x16xbf16>
    %c0_4 = arith.constant 0 : index
    %c0_5 = arith.constant 0 : index
    %8 = vector.load %arg9[%c0_4, %c0_5] : memref<256x16xf32, #tpu.memory_space<vmem>>, vector<256x16xf32>
    %c0_6 = arith.constant 0 : index
    %c0_7 = arith.constant 0 : index
    %9 = vector.load %arg2[%c0_6, %c0_7] : memref<256x512xbf16, #tpu.memory_space<vmem>>, vector<256x512xbf16>
    %cst = arith.constant dense<0.000000e+00> : vector<256x16xf32>
    %10 = tpu.matmul %9, %7, %cst {dimension_numbers = #tpu.dot_dimension_numbers<[1], [0], [0], [1], [0, 0, 1, 1], [], []>} : vector<256x512xbf16>, vector<512x16xbf16>, vector<256x16xf32> -> vector<256x16xf32>
    %11 = arith.addf %8, %10 : vector<256x16xf32>
    %c0_8 = arith.constant 0 : index
    %c0_9 = arith.constant 0 : index
    %12 = vector.load %arg9[%c0_8, %c0_9] : memref<256x16xf32, #tpu.memory_space<vmem>>, vector<256x16xf32>
    tpu.vector_store %arg9[%c0_8, %c0_9], %11 {strides = array<i32>} : memref<256x16xf32, #tpu.memory_space<vmem>>, vector<256x16xf32>,
    %c0_i32_10 = arith.constant 0 : i32
    %13 = arith.cmpi eq, %arg1, %c0_i32_10 : i32
    %14 = arith.extui %13 : i1 to i32
    %c0_i32_11 = arith.constant 0 : i32
    %15 = arith.cmpi ne, %14, %c0_i32_11 : i32
    scf.if %15 {
      %c0_12 = arith.constant 0 : index
      %c0_13 = arith.constant 0 : index
      %16 = vector.load %arg9[%c0_12, %c0_13] : memref<256x16xf32, #tpu.memory_space<vmem>>, vector<256x16xf32>
      %c0_14 = arith.constant 0 : index
      %c0_15 = arith.constant 0 : index
      %17 = vector.load %arg4[%c0_14, %c0_15] : memref<256x1xf32, #tpu.memory_space<vmem>>, vector<256x1xf32>
      %18 = vector.broadcast %17 : vector<256x1xf32> to vector<256x16xf32>
      %19 = arith.mulf %16, %18 : vector<256x16xf32>
      %c0_16 = arith.constant 0 : index
      %c0_17 = arith.constant 0 : index
      %20 = vector.load %arg6[%c0_16, %c0_17] : memref<16x32xf32, #tpu.memory_space<vmem>>, vector<16x32xf32>
      %cst_18 = arith.constant dense<0.000000e+00> : vector<256x32xf32>
      %21 = tpu.matmul %19, %20, %cst_18 {dimension_numbers = #tpu.dot_dimension_numbers<[1], [0], [0], [1], [0, 0, 1, 1], [], []>} : vector<256x16xf32>, vector<16x32xf32>, vector<256x32xf32> -> vector<256x32xf32>
      %c0_19 = arith.constant 0 : index
      %c0_20 = arith.constant 0 : index
      %22 = vector.load %arg7[%c0_19, %c0_20] : memref<1x32xf32, #tpu.memory_space<vmem>>, vector<1x32xf32>
      %23 = vector.broadcast %22 : vector<1x32xf32> to vector<256x32xf32>
      %24 = arith.addf %21, %23 : vector<256x32xf32>
      %25 = math.tanh %24 : vector<256x32xf32>
      %c0_21 = arith.constant 0 : index
      %c0_22 = arith.constant 0 : index
      %26 = vector.load %arg8[%c0_21, %c0_22] : memref<256x32xf32, #tpu.memory_space<vmem>>, vector<256x32xf32>
      tpu.vector_store %arg8[%c0_21, %c0_22], %25 {strides = array<i32>} : memref<256x32xf32, #tpu.memory_space<vmem>>, vector<256x32xf32>,
    } else {
    }
    return
  }
  func.func @transform_0(%arg0: i32, %arg1: i32) -> (i32, i32) {
    %c0_i32 = arith.constant 0 : i32
    return %arg0, %arg1 : i32, i32
  }
  func.func @transform_1(%arg0: i32, %arg1: i32) -> (i32, i32) {
    %c0_i32 = arith.constant 0 : i32
    %c0_i32_0 = arith.constant 0 : i32
    return %arg1, %c0_i32 : i32, i32
  }
  func.func @transform_2(%arg0: i32, %arg1: i32) -> (i32, i32) {
    %c0_i32 = arith.constant 0 : i32
    %c0_i32_0 = arith.constant 0 : i32
    return %arg0, %c0_i32 : i32, i32
  }
  func.func @transform_3(%arg0: i32, %arg1: i32) -> (i32, i32) {
    %c0_i32 = arith.constant 0 : i32
    %c0_i32_0 = arith.constant 0 : i32
    return %arg1, %c0_i32 : i32, i32
  }
  func.func @transform_4(%arg0: i32, %arg1: i32) -> (i32, i32) {
    %c0_i32 = arith.constant 0 : i32
    %c0_i32_0 = arith.constant 0 : i32
    %c0_i32_1 = arith.constant 0 : i32
    return %c0_i32, %c0_i32_0 : i32, i32
  }
  func.func @transform_5(%arg0: i32, %arg1: i32) -> (i32, i32) {
    %c0_i32 = arith.constant 0 : i32
    %c0_i32_0 = arith.constant 0 : i32
    %c0_i32_1 = arith.constant 0 : i32
    return %c0_i32, %c0_i32_0 : i32, i32
  }
  func.func @transform_6(%arg0: i32, %arg1: i32) -> (i32, i32) {
    %c0_i32 = arith.constant 0 : i32
    %c0_i32_0 = arith.constant 0 : i32
    return %arg0, %c0_i32 : i32, i32
  }
}

</mosaic_0001>

<bundles_post_ra>
// kernel: tpu_custom_call.1
= control target key start
LH: loop header
LB: loop body
LE: loop exit
PB: predicated region body
PF: predicated region fallthrough
CT: control target
= control target key end

     0   :  { %s3197_s21 = smov 0   ;;  %s3199_s22 = smov 0   ;;  %s4029_s0 = inlined_call_operand.vmem [shape: bf16[512,512], index: 0, kind: input, shape index: {}]   ;;  %s4030_s1 = inlined_call_operand.vmem [shape: f32[512,1], index: 1, kind: input, shape index: {}]   ;;  %s4031_s2 = inlined_call_operand.vmem [shape: f32[512,1], index: 2, kind: input, shape index: {}]   ;;  %s4032_s3 = inlined_call_operand.vmem [shape: f32[512,16], index: 3, kind: input, shape index: {}]   ;;  %s4033_s4 = inlined_call_operand.vmem [shape: f32[16,32], index: 4, kind: input, shape index: {}]   ;;  %s4034_s5 = inlined_call_operand.vmem [shape: f32[1,32], index: 5, kind: input, shape index: {}]   ;;  %s4035_s6 = inlined_call_operand.vmem [shape: f32[512,32], index: 6, kind: output, shape index: {}]  }
   0x1   :  { %s3201_s23 = smov 0  }
   0x2 LB: > { %s28_s24 = sadd.s32 1, %s3154_s22  ;;  %p2510_p0 = scmp.ge.s32.totalorder %s3158_s23, 1  ;;  %s3158_s23 = sphi %s3201_s23, %s16_s23   ;;  %s3154_s22 = sphi %s3199_s22, %s4037_s22   ;;  %s3150_s21 = sphi %s3197_s21, %s4036_s21  }
   0x3   : > { %p30_p1 = scmp.ge.s32.totalorder %s28_s24, 2  ;;  %p266_p2 = scmp.lt.s32.totalorder %s3158_s23, 3 }
   0x5   : > { %s4039_s24 = smov (%p30_p1, %s28_s24), 0  ;;  %p267_p3 = pnand %p2510_p0, %p266_p2 }
   0x6   : > { %v470_v0 = vld [vmem:[%s4030_s1 + $0x80] sm:$0xff] (!%p267_p3)  ;;  %v3160_v2 = vmov (!%p267_p3), 0   ;;  %v471_v3 = vld [vmem:[%s4030_s1 + $0x88] sm:$0xff] (!%p267_p3)  ;;  %v472_v5 = vld [vmem:[%s4030_s1 + $0x90] sm:$0xff] (!%p267_p3)  ;;  %s2511_s29 = sshll.u32 (!%p267_p3), %s3150_s21, 5  ;;  %vm357_vm0 = vcmask (!%p267_p3), 130048  }
   0x7   : > { %270 = sbr.rel (%p267_p3) target bundleno = 845 (0x34d), region = 44  ;;  %v454_v1 = vld [vmem:[%s4030_s1] sm:$0xff] (!%p267_p3)  ;;  %2975 = vset.pattern.permute.xlu1 (!%p267_p3), %v3160_v2  ;;  %2974 = vset.pattern.permute.xlu0 (!%p267_p3), %v3160_v2  ;;  %v455_v4 = vld [vmem:[%s4030_s1 + $0x8] sm:$0xff] (!%p267_p3)  ;;  %v473_v6 = vld [vmem:[%s4030_s1 + $0x98] sm:$0xff] (!%p267_p3)  ;;  %p318_p4 = scmp.lt.s32.totalorder (!%p267_p3), %s2511_s29, 63  ;;  %vm2358_vm1 = vcmask (!%p267_p3), 261120  }
   0x8   : > { %600 = vperm.xlu0 (!%p267_p3), %2974, %v470_v0   ;;  %520 = vperm.xlu1 (!%p267_p3), %2975, %v454_v1   ;;  %v456_v7 = vld [vmem:[%s4030_s1 + $0x10] sm:$0xff] (!%p267_p3)  ;;  %v457_v8 = vld [vmem:[%s4030_s1 + $0x18] sm:$0xff] (!%p267_p3)  ;;  %v474_v9 = vld [vmem:[%s4030_s1 + $0xa0] sm:$0xff] (!%p267_p3) }
   0x9   : > { %v475_v10 = vld [vmem:[%s4030_s1 + $0xa8] sm:$0xff] (!%p267_p3)  ;;  %v458_v11 = vld [vmem:[%s4030_s1 + $0x20] sm:$0xff] (!%p267_p3)  ;;  %v476_v13 = vld [vmem:[%s4030_s1 + $0xb0] sm:$0xff] (!%p267_p3) }
   0xa   : > { %v459_v12 = vld [vmem:[%s4030_s1 + $0x28] sm:$0xff] (!%p267_p3)  ;;  %v477_v14 = vld [vmem:[%s4030_s1 + $0xb8] sm:$0xff] (!%p267_p3)  ;;  %v460_v15 = vld [vmem:[%s4030_s1 + $0x30] sm:$0xff] (!%p267_p3) }
   0xb   : > { %v461_v16 = vld [vmem:[%s4030_s1 + $0x38] sm:$0xff] (!%p267_p3)  ;;  %v478_v17 = vld [vmem:[%s4030_s1 + $0xc0] sm:$0xff] (!%p267_p3)  ;;  %v479_v18 = vld [vmem:[%s4030_s1 + $0xc8] sm:$0xff] (!%p267_p3) }
   0xc   : > { %605 = vperm.xlu0 (!%p267_p3), %2974, %v471_v3   ;;  %525 = vperm.xlu1 (!%p267_p3), %2975, %v455_v4   ;;  %v462_v19 = vld [vmem:[%s4030_s1 + $0x40] sm:$0xff] (!%p267_p3)  ;;  %v463_v20 = vld [vmem:[%s4030_s1 + $0x48] sm:$0xff] (!%p267_p3)  ;;  %v480_v21 = vld [vmem:[%s4030_s1 + $0xd0] sm:$0xff] (!%p267_p3) }
   0xd   : > { %v481_v22 = vld [vmem:[%s4030_s1 + $0xd8] sm:$0xff] (!%p267_p3)  ;;  %v464_v23 = vld [vmem:[%s4030_s1 + $0x50] sm:$0xff] (!%p267_p3)  ;;  %v482_v25 = vld [vmem:[%s4030_s1 + $0xe0] sm:$0xff] (!%p267_p3) }
   0xe   : > { %s4041_s29 = smov (!%p318_p4, %s2511_s29), 63  ;;  %v465_v24 = vld [vmem:[%s4030_s1 + $0x58] sm:$0xff]  ;;  %v483_v26 = vld [vmem:[%s4030_s1 + $0xe8] sm:$0xff]  ;;  %v466_v27 = vld [vmem:[%s4030_s1 + $0x60] sm:$0xff] }
   0xf   : > { %s2617_s13 = sshll.u32 %s4041_s29, 4  ;;  %v467_v28 = vld [vmem:[%s4030_s1 + $0x68] sm:$0xff]  ;;  %v484_v29 = vld [vmem:[%s4030_s1 + $0xf0] sm:$0xff]  ;;  %v485_v30 = vld [vmem:[%s4030_s1 + $0xf8] sm:$0xff] }
  0x10   : > { %610 = vperm.xlu0 %2974, %v472_v5   ;;  %615 = vperm.xlu1 %2975, %v473_v6   ;;  %s3278_s20 = scalar_lea.vmem %s4029_s0, %s2617_s13  ;;  %v468_v31 = vld [vmem:[%s4030_s1 + $0x70] sm:$0xff]  ;;  %v469_v32 = vld [vmem:[%s4030_s1 + $0x78] sm:$0xff]  ;;  %v502_v33 = vld [vmem:[%s4030_s1 + $0x180] sm:$0xff]  ;;  %s2515_s13 = sshll.u32 %s4041_s29, 3 }
  0x11   : > { %v503_v34 = vld [vmem:[%s4030_s1 + $0x188] sm:$0xff]  ;;  %v486_v35 = vld [vmem:[%s4030_s1 + $0x100] sm:$0xff]  ;;  %v504_v37 = vld [vmem:[%s4030_s1 + $0x190] sm:$0xff]  ;;  %s3425_s25 = scalar_lea.vmem %s4031_s2, %s2515_s13  ;;  %s3926_s15 = scalar_lea.vmem %s4035_s6, %s2515_s13 }
  0x12   : > { %v487_v36 = vld [vmem:[%s4030_s1 + $0x108] sm:$0xff]  ;;  %v505_v38 = vld [vmem:[%s4030_s1 + $0x198] sm:$0xff]  ;;  %v2978_v39 = vld [vmem:[%s3278_s20 + $0x184] ss:$16 sps:$4 sm:$0xff]  }
  0x13   : > { %v488_v40 = vld [vmem:[%s4030_s1 + $0x110] sm:$0xff]  ;;  %v489_v41 = vld [vmem:[%s4030_s1 + $0x118] sm:$0xff]  ;;  %1478 = vmatprep.mubr.bf16.mxu1 %v2978_v39  ;;  %v506_v42 = vld [vmem:[%s4030_s1 + $0x1a0] sm:$0xff] }
  0x14   : > { %530 = vperm.xlu0 %2974, %v456_v7   ;;  %535 = vperm.xlu1 %2975, %v457_v8   ;;  %v507_v43 = vld [vmem:[%s4030_s1 + $0x1a8] sm:$0xff]  ;;  %v490_v44 = vld [vmem:[%s4030_s1 + $0x120] sm:$0xff]  ;;  %v508_v46 = vld [vmem:[%s4030_s1 + $0x1b0] sm:$0xff] }
  0x15   : > { %v491_v45 = vld [vmem:[%s4030_s1 + $0x128] sm:$0xff]  ;;  %v509_v47 = vld [vmem:[%s4030_s1 + $0x1b8] sm:$0xff]  ;;  %v492_v48 = vld [vmem:[%s4030_s1 + $0x130] sm:$0xff] }
  0x16   : > { %v493_v49 = vld [vmem:[%s4030_s1 + $0x138] sm:$0xff]  ;;  %v510_v50 = vld [vmem:[%s4030_s1 + $0x1c0] sm:$0xff]  ;;  %v511_v51 = vld [vmem:[%s4030_s1 + $0x1c8] sm:$0xff] }
  0x17   : > { %v494_v52 = vld [vmem:[%s4030_s1 + $0x140] sm:$0xff]  ;;  %v495_v53 = vld [vmem:[%s4030_s1 + $0x148] sm:$0xff]  ;;  %v512_v54 = vld [vmem:[%s4030_s1 + $0x1d0] sm:$0xff] }
  0x18   : > { %620 = vperm.xlu0 %2974, %v474_v9   ;;  %625 = vperm.xlu1 %2975, %v475_v10   ;;  %v513_v55 = vld [vmem:[%s4030_s1 + $0x1d8] sm:$0xff]  ;;  %v496_v56 = vld [vmem:[%s4030_s1 + $0x150] sm:$0xff]  ;;  %v514_v58 = vld [vmem:[%s4030_s1 + $0x1e0] sm:$0xff] }
  0x19   : > { %v497_v57 = vld [vmem:[%s4030_s1 + $0x158] sm:$0xff]  ;;  %v515_v59 = vld [vmem:[%s4030_s1 + $0x1e8] sm:$0xff]  ;;  %v498_v60 = vld [vmem:[%s4030_s1 + $0x160] sm:$0xff] }
  0x1a   : > { %v499_v61 = vld [vmem:[%s4030_s1 + $0x168] sm:$0xff]  ;;  %v516_v62 = vld [vmem:[%s4030_s1 + $0x1f0] sm:$0xff]  ;;  %v517_v63 = vld [vmem:[%s4030_s1 + $0x1f8] sm:$0xff] }
  0x1b   : > { %v500_v0 = vld [vmem:[%s4030_s1 + $0x170] sm:$0xff]  ;;  %v501_v1 = vld [vmem:[%s4030_s1 + $0x178] sm:$0xff]  ;;  %v1773_v2 = vld [vmem:[%s3425_s25 + $0x8] sm:$0xff] }
  0x1c   : > { %540 = vperm.xlu0 %2974, %v458_v11   ;;  %545 = vperm.xlu1 %2975, %v459_v12   ;;  %v1772_v3 = vld [vmem:[%s3425_s25] sm:$0xff]  ;;  %v407_v8 = vld [vmem:[%s4032_s3 + $0x88] sm:$0xff]  ;;  %v1775_v11 = vld [vmem:[%s3425_s25 + $0x18] sm:$0xff] }
  0x1d   : > { %v406_v5 = vld [vmem:[%s4032_s3 + $0x80] sm:$0xff]  ;;  %v391_v10 = vld [vmem:[%s4032_s3 + $0x8] sm:$0xff]  ;;  %v1774_v12 = vld [vmem:[%s3425_s25 + $0x10] sm:$0xff] }
  0x1e   : > { %v390_v7 = vld [vmem:[%s4032_s3] sm:$0xff]  ;;  %v411_v39 = vld [vmem:[%s4032_s3 + $0xa8] sm:$0xff] }
  0x1f   : > { %v2990_v9 = vld [vmem:[%s3278_s20 + $0x4] ss:$16 sps:$4 sm:$0xff]  }
  0x20   : > { %630 = vperm.xlu0 %2974, %v476_v13   ;;  %635 = vperm.xlu1 %2975, %v477_v14  }
  0x21   : > { %1382 = vmatprep.mubr.bf16.mxu0 %v2990_v9 }
  0x24   : > { %550 = vperm.xlu0 %2974, %v460_v15   ;;  %555 = vperm.xlu1 %2975, %v461_v16  }
  0x28   : > { %640 = vperm.xlu0 %2974, %v478_v17   ;;  %645 = vperm.xlu1 %2975, %v479_v18  }
  0x2c   : > { %560 = vperm.xlu0 %2974, %v462_v19   ;;  %565 = vperm.xlu1 %2975, %v463_v20   ;;  %v408_v19 = vld [vmem:[%s4032_s3 + $0x90] sm:$0xff]  ;;  %v409_v20 = vld [vmem:[%s4032_s3 + $0x98] sm:$0xff] }
  0x30   : > { %650 = vperm.xlu0 %2974, %v480_v21   ;;  %655 = vperm.xlu1 %2975, %v481_v22   ;;  %v1777_v22 = vld [vmem:[%s3425_s25 + $0x28] sm:$0xff] }
  0x34   : > { %570 = vperm.xlu0 %2974, %v464_v23   ;;  %575 = vperm.xlu1 %2975, %v465_v24   ;;  %v1776_v23 = vld [vmem:[%s3425_s25 + $0x20] sm:$0xff] }
  0x38   : > { %660 = vperm.xlu0 %2974, %v482_v25   ;;  %665 = vperm.xlu1 %2975, %v483_v26  }
  0x3c   : > { %580 = vperm.xlu0 %2974, %v466_v27   ;;  %585 = vperm.xlu1 %2975, %v467_v28  }
  0x40   : > { %670 = vperm.xlu0 %2974, %v484_v29   ;;  %675 = vperm.xlu1 %2975, %v485_v30   ;;  %v392_v29 = vld [vmem:[%s4032_s3 + $0x10] sm:$0xff]  ;;  %v393_v30 = vld [vmem:[%s4032_s3 + $0x18] sm:$0xff] }
  0x44   : > { %590 = vperm.xlu0 %2974, %v468_v31   ;;  %595 = vperm.xlu1 %2975, %v469_v32   ;;  %v1779_v32 = vld [vmem:[%s3425_s25 + $0x38] sm:$0xff] }
  0x48   : > { %760 = vperm.xlu0 %2974, %v502_v33   ;;  %765 = vperm.xlu1 %2975, %v503_v34   ;;  %v1778_v33 = vld [vmem:[%s3425_s25 + $0x30] sm:$0xff] }
  0x4c   : > { %680 = vperm.xlu0 %2974, %v486_v35   ;;  %685 = vperm.xlu1 %2975, %v487_v36  }
  0x50   : > { %770 = vperm.xlu0 %2974, %v504_v37   ;;  %775 = vperm.xlu1 %2975, %v505_v38   ;;  %v410_v38 = vld [vmem:[%s4032_s3 + $0xa0] sm:$0xff] }
  0x54   : > { %690 = vperm.xlu0 %2974, %v488_v40   ;;  %695 = vperm.xlu1 %2975, %v489_v41   ;;  %v1781_v41 = vld [vmem:[%s3425_s25 + $0x48] sm:$0xff] }
  0x58   : > { %780 = vperm.xlu0 %2974, %v506_v42   ;;  %785 = vperm.xlu1 %2975, %v507_v43   ;;  %v1780_v42 = vld [vmem:[%s3425_s25 + $0x40] sm:$0xff] }
  0x5c   : > { %700 = vperm.xlu0 %2974, %v490_v44   ;;  %705 = vperm.xlu1 %2975, %v491_v45  }
  0x60   : > { %790 = vperm.xlu0 %2974, %v508_v46   ;;  %795 = vperm.xlu1 %2975, %v509_v47   ;;  %v394_v47 = vld [vmem:[%s4032_s3 + $0x20] sm:$0xff] }
  0x64   : > { %710 = vperm.xlu0 %2974, %v492_v48   ;;  %715 = vperm.xlu1 %2975, %v493_v49   ;;  %v395_v48 = vld [vmem:[%s4032_s3 + $0x28] sm:$0xff] }
  0x68   : > { %800 = vperm.xlu0 %2974, %v510_v50   ;;  %805 = vperm.xlu1 %2975, %v511_v51   ;;  %v1783_v50 = vld [vmem:[%s3425_s25 + $0x58] sm:$0xff]  ;;  %v1782_v51 = vld [vmem:[%s3425_s25 + $0x50] sm:$0xff] }
  0x6c   : > { %720 = vperm.xlu0 %2974, %v494_v52   ;;  %725 = vperm.xlu1 %2975, %v495_v53  }
  0x70   : > { %810 = vperm.xlu0 %2974, %v512_v54   ;;  %815 = vperm.xlu1 %2975, %v513_v55  }
  0x74   : > { %730 = vperm.xlu0 %2974, %v496_v56   ;;  %735 = vperm.xlu1 %2975, %v497_v57   ;;  %v412_v56 = vld [vmem:[%s4032_s3 + $0xb0] sm:$0xff]  ;;  %v413_v57 = vld [vmem:[%s4032_s3 + $0xb8] sm:$0xff] }
  0x78   : > { %820 = vperm.xlu0 %2974, %v514_v58   ;;  %825 = vperm.xlu1 %2975, %v515_v59   ;;  %v1785_v59 = vld [vmem:[%s3425_s25 + $0x68] sm:$0xff] }
  0x7c   : > { %740 = vperm.xlu0 %2974, %v498_v60   ;;  %745 = vperm.xlu1 %2975, %v499_v61   ;;  %v1784_v60 = vld [vmem:[%s3425_s25 + $0x60] sm:$0xff] }
  0x80   : > { %830 = vperm.xlu0 %2974, %v516_v62   ;;  %835 = vperm.xlu1 %2975, %v517_v63  }
  0x84   : > { %750 = vperm.xlu0 %2974, %v500_v0   ;;  %755 = vperm.xlu1 %2975, %v501_v1   ;;  %v396_v1 = vld [vmem:[%s4032_s3 + $0x30] sm:$0xff] }
  0x87   : > { %v601_v4 = vpop.permute.xlu0 %600  ;;  %v521_v6 = vpop.permute.xlu1 %520 }
  0x88   : > { %1811 = vperm.xlu1 %2975, %v1773_v2   ;;  %1806 = vperm.xlu0 %2974, %v1772_v3   ;;  %v854_v13 = vmul.f32 %v601_v4, %v406_v5  ;;  %v838_v16 = vmul.f32 %v521_v6, %v390_v7  ;;  %v397_v2 = vld [vmem:[%s4032_s3 + $0x38] sm:$0xff]  ;;  %v1786_v5 = vld [vmem:[%s3425_s25 + $0x70] sm:$0xff] }
  0x89   : > { %v1787_v4 = vld [vmem:[%s3425_s25 + $0x78] sm:$0xff] }
  0x8b   : > { %v606_v14 = vpop.permute.xlu0 %605  ;;  %v526_v15 = vpop.permute.xlu1 %525 }
  0x8c   : > { %v855_v17 = vmul.f32 %v606_v14, %v407_v8  ;;  %v839_v18 = vmul.f32 %v526_v15, %v391_v10  ;;  %1821 = vperm.xlu1 %2975, %v1775_v11   ;;  %1816 = vperm.xlu0 %2974, %v1774_v12   ;;  %v414_v10 = vld [vmem:[%s4032_s3 + $0xc0] sm:$0xff]  ;;  %v415_v11 = vld [vmem:[%s4032_s3 + $0xc8] sm:$0xff] }
  0x8d   : > { %v1788_v14 = vld [vmem:[%s3425_s25 + $0x80] sm:$0xff] }
  0x8e   : > { %v910_v21 = vpack.c.bf16 %v855_v17, %v854_v13  ;;  %v902_v24 = vpack.c.bf16 %v839_v18, %v838_v16  ;;  %v1789_v13 = vld [vmem:[%s3425_s25 + $0x88] sm:$0xff] }
  0x8f   : > { %v611_v25 = vpop.permute.xlu0 %610  ;;  %v616_v26 = vpop.permute.xlu1 %615 }
  0x90   : > { %v856_v27 = vmul.f32 %v611_v25, %v408_v19  ;;  %v857_v28 = vmul.f32 %v616_v26, %v409_v20  ;;  %2618 = vmatprep.subr.bf16.mxu0 %v910_v21  ;;  %2932 = vmatprep.subr.bf16.mxu1 %v910_v21  ;;  %v398_v19 = vld [vmem:[%s4032_s3 + $0x40] sm:$0xff]  ;;  %v399_v20 = vld [vmem:[%s4032_s3 + $0x48] sm:$0xff] }
  0x91   : > { %1831 = vperm.xlu1 %2975, %v1777_v22   ;;  %1826 = vperm.xlu0 %2974, %v1776_v23   ;;  %v1791_v22 = vld [vmem:[%s3425_s25 + $0x98] sm:$0xff]  ;;  %v1790_v23 = vld [vmem:[%s3425_s25 + $0x90] sm:$0xff] }
  0x92   : > { %v911_v31 = vpack.c.bf16 %v857_v28, %v856_v27  ;;  %2619 = vmatpush3.bf16.msra.mxu0 %v902_v24  ;;  %2940 = vmatpush3.bf16.msra.mxu1 %v902_v24  ;;  %v416_v28 = vld [vmem:[%s4032_s3 + $0xd0] sm:$0xff] }
  0x93   : > { %v531_v34 = vpop.permute.xlu0 %530  ;;  %v536_v35 = vpop.permute.xlu1 %535 }
  0x94   : > { %v840_v36 = vmul.f32 %v531_v34, %v392_v29  ;;  %v841_v37 = vmul.f32 %v536_v35, %v393_v30  ;;  %2620 = vmatprep.subr.bf16.mxu0 %v911_v31  ;;  %2933 = vmatprep.subr.bf16.mxu1 %v911_v31  ;;  %v417_v29 = vld [vmem:[%s4032_s3 + $0xd8] sm:$0xff]  ;;  %v1793_v31 = vld [vmem:[%s3425_s25 + $0xa8] sm:$0xff] }
  0x95   : > { %1841 = vperm.xlu1 %2975, %v1779_v32   ;;  %1836 = vperm.xlu0 %2974, %v1778_v33   ;;  %v1792_v32 = vld [vmem:[%s3425_s25 + $0xa0] sm:$0xff] }
  0x96   : > { %v903_v40 = vpack.c.bf16 %v841_v37, %v840_v36  ;;  %v400_v37 = vld [vmem:[%s4032_s3 + $0x50] sm:$0xff] }
  0x97   : > { %v621_v43 = vpop.permute.xlu0 %620  ;;  %v626_v44 = vpop.permute.xlu1 %625 }
  0x98   : > { %v858_v45 = vmul.f32 %v621_v43, %v410_v38  ;;  %v859_v46 = vmul.f32 %v626_v44, %v411_v39  ;;  %2621 = vmatpush3.bf16.msra.mxu0 %v903_v40  ;;  %2941 = vmatpush3.bf16.msra.mxu1 %v903_v40  ;;  %v401_v38 = vld [vmem:[%s4032_s3 + $0x58] sm:$0xff] }
  0x99   : > { %1851 = vperm.xlu1 %2975, %v1781_v41   ;;  %1846 = vperm.xlu0 %2974, %v1780_v42   ;;  %v1795_v40 = vld [vmem:[%s3425_s25 + $0xb8] sm:$0xff]  ;;  %v1794_v41 = vld [vmem:[%s3425_s25 + $0xb0] sm:$0xff] }
  0x9a   : > { %v912_v49 = vpack.c.bf16 %v859_v46, %v858_v45  ;;  %v418_v46 = vld [vmem:[%s4032_s3 + $0xe0] sm:$0xff] }
  0x9b   : > { %v541_v52 = vpop.permute.xlu0 %540  ;;  %v546_v53 = vpop.permute.xlu1 %545 }
  0x9c   : > { %v842_v54 = vmul.f32 %v541_v52, %v394_v47  ;;  %v843_v55 = vmul.f32 %v546_v53, %v395_v48  ;;  %2622 = vmatprep.subr.bf16.mxu0 %v912_v49  ;;  %2934 = vmatprep.subr.bf16.mxu1 %v912_v49  ;;  %v419_v47 = vld [vmem:[%s4032_s3 + $0xe8] sm:$0xff] }
  0x9d   : > { %1861 = vperm.xlu1 %2975, %v1783_v50   ;;  %1856 = vperm.xlu0 %2974, %v1782_v51   ;;  %v1797_v49 = vld [vmem:[%s3425_s25 + $0xc8] sm:$0xff]  ;;  %v1796_v50 = vld [vmem:[%s3425_s25 + $0xc0] sm:$0xff] }
  0x9e   : > { %v904_v58 = vpack.c.bf16 %v843_v55, %v842_v54  ;;  %v402_v55 = vld [vmem:[%s4032_s3 + $0x60] sm:$0xff] }
  0x9f   : > { %v631_v61 = vpop.permute.xlu0 %630  ;;  %v636_v62 = vpop.permute.xlu1 %635 }
  0xa0   : > { %v860_v63 = vmul.f32 %v631_v61, %v412_v56  ;;  %v861_v0 = vmul.f32 %v636_v62, %v413_v57  ;;  %2623 = vmatpush3.bf16.msra.mxu0 %v904_v58  ;;  %2942 = vmatpush3.bf16.msra.mxu1 %v904_v58  ;;  %v403_v56 = vld [vmem:[%s4032_s3 + $0x68] sm:$0xff]  ;;  %v1799_v58 = vld [vmem:[%s3425_s25 + $0xd8] sm:$0xff] }
  0xa1   : > { %1871 = vperm.xlu1 %2975, %v1785_v59   ;;  %1866 = vperm.xlu0 %2974, %v1784_v60   ;;  %v1798_v59 = vld [vmem:[%s3425_s25 + $0xd0] sm:$0xff] }
  0xa2   : > { %v913_v3 = vpack.c.bf16 %v861_v0, %v860_v63  ;;  %v420_v0 = vld [vmem:[%s4032_s3 + $0xf0] sm:$0xff] }
  0xa3   : > { %v551_v6 = vpop.permute.xlu0 %550  ;;  %v556_v7 = vpop.permute.xlu1 %555 }
  0xa4   : > { %v844_v8 = vmul.f32 %v551_v6, %v396_v1  ;;  %v845_v9 = vmul.f32 %v556_v7, %v397_v2  ;;  %2624 = vmatprep.subr.bf16.mxu0 %v913_v3  ;;  %2935 = vmatprep.subr.bf16.mxu1 %v913_v3  ;;  %v421_v1 = vld [vmem:[%s4032_s3 + $0xf8] sm:$0xff]  ;;  %v1801_v3 = vld [vmem:[%s3425_s25 + $0xe8] sm:$0xff] }
  0xa5   : > { %1881 = vperm.xlu1 %2975, %v1787_v4   ;;  %1876 = vperm.xlu0 %2974, %v1786_v5   ;;  %v1800_v4 = vld [vmem:[%s3425_s25 + $0xe0] sm:$0xff] }
  0xa6   : > { %v905_v12 = vpack.c.bf16 %v845_v9, %v844_v8  ;;  %v404_v9 = vld [vmem:[%s4032_s3 + $0x70] sm:$0xff] }
  0xa7   : > { %v641_v15 = vpop.permute.xlu0 %640  ;;  %v646_v16 = vpop.permute.xlu1 %645 }
  0xa8   : > { %v862_v17 = vmul.f32 %v641_v15, %v414_v10  ;;  %v863_v18 = vmul.f32 %v646_v16, %v415_v11  ;;  %2625 = vmatpush3.bf16.msra.mxu0 %v905_v12  ;;  %2943 = vmatpush3.bf16.msra.mxu1 %v905_v12  ;;  %v405_v10 = vld [vmem:[%s4032_s3 + $0x78] sm:$0xff] }
  0xa9   : > { %1891 = vperm.xlu1 %2975, %v1789_v13   ;;  %1886 = vperm.xlu0 %2974, %v1788_v14   ;;  %v1803_v12 = vld [vmem:[%s3425_s25 + $0xf8] sm:$0xff]  ;;  %v1802_v13 = vld [vmem:[%s3425_s25 + $0xf0] sm:$0xff] }
  0xaa   : > { %v914_v21 = vpack.c.bf16 %v863_v18, %v862_v17  ;;  %v438_v18 = vld [vmem:[%s4032_s3 + $0x180] sm:$0xff] }
  0xab   : > { %v561_v24 = vpop.permute.xlu0 %560  ;;  %v566_v25 = vpop.permute.xlu1 %565 }
  0xac   : > { %v846_v26 = vmul.f32 %v561_v24, %v398_v19  ;;  %v847_v27 = vmul.f32 %v566_v25, %v399_v20  ;;  %2626 = vmatprep.subr.bf16.mxu0 %v914_v21  ;;  %2936 = vmatprep.subr.bf16.mxu1 %v914_v21  ;;  %v439_v19 = vld [vmem:[%s4032_s3 + $0x188] sm:$0xff]  ;;  %v2988_v24 = vld [vmem:[%s3278_s20] ss:$16 sps:$4 sm:$0xff]  }
  0xad   : > { %1901 = vperm.xlu1 %2975, %v1791_v22   ;;  %1896 = vperm.xlu0 %2974, %v1790_v23   ;;  %v2976_v23 = vld [vmem:[%s3278_s20 + $0x180] ss:$16 sps:$4 sm:$0xff]  }
  0xae   : > { %v906_v30 = vpack.c.bf16 %v847_v27, %v846_v26  ;;  %v2979_v27 = vld [vmem:[%s3278_s20 + $0x1a4] ss:$16 sps:$4 sm:$0xff]  }
  0xaf   : > { %v651_v33 = vpop.permute.xlu0 %650  ;;  %v656_v34 = vpop.permute.xlu1 %655 }
  0xb0   : > { %v864_v35 = vmul.f32 %v651_v33, %v416_v28  ;;  %v865_v36 = vmul.f32 %v656_v34, %v417_v29  ;;  %2627 = vmatpush3.bf16.msra.mxu0 %v906_v30  ;;  %2944 = vmatpush3.bf16.msra.mxu1 %v906_v30  ;;  %v422_v28 = vld [vmem:[%s4032_s3 + $0x100] sm:$0xff]  ;;  %v423_v29 = vld [vmem:[%s4032_s3 + $0x108] sm:$0xff] }
  0xb1   : > { %1911 = vperm.xlu1 %2975, %v1793_v31   ;;  %1906 = vperm.xlu0 %2974, %v1792_v32   ;;  %v2994_v30 = vld [vmem:[%s3278_s20 + $0x24] ss:$16 sps:$4 sm:$0xff]  }
  0xb2   : > { %v915_v39 = vpack.c.bf16 %v865_v36, %v864_v35  ;;  %v440_v36 = vld [vmem:[%s4032_s3 + $0x190] sm:$0xff] }
  0xb3   : > { %v571_v42 = vpop.permute.xlu0 %570  ;;  %v576_v43 = vpop.permute.xlu1 %575 }
  0xb4   : > { %v848_v44 = vmul.f32 %v571_v42, %v400_v37  ;;  %v849_v45 = vmul.f32 %v576_v43, %v401_v38  ;;  %2628 = vmatprep.subr.bf16.mxu0 %v915_v39  ;;  %2937 = vmatprep.subr.bf16.mxu1 %v915_v39  ;;  %v441_v37 = vld [vmem:[%s4032_s3 + $0x198] sm:$0xff]  ;;  %v2998_v42 = vld [vmem:[%s3278_s20 + $0x20] ss:$16 sps:$4 sm:$0xff]  }
  0xb5   : > { %1921 = vperm.xlu1 %2975, %v1795_v40   ;;  %1916 = vperm.xlu0 %2974, %v1794_v41   ;;  %v2981_v41 = vld [vmem:[%s3278_s20 + $0x1a0] ss:$16 sps:$4 sm:$0xff]  }
  0xb6   : > { %v907_v48 = vpack.c.bf16 %v849_v45, %v848_v44  ;;  %v2982_v45 = vld [vmem:[%s3278_s20 + $0x1c4] ss:$16 sps:$4 sm:$0xff]  }
  0xb7   : > { %v661_v51 = vpop.permute.xlu0 %660  ;;  %v666_v52 = vpop.permute.xlu1 %665 }
  0xb8   : > { %v866_v53 = vmul.f32 %v661_v51, %v418_v46  ;;  %v867_v54 = vmul.f32 %v666_v52, %v419_v47  ;;  %2629 = vmatpush3.bf16.msra.mxu0 %v907_v48  ;;  %2945 = vmatpush3.bf16.msra.mxu1 %v907_v48  ;;  %v424_v46 = vld [vmem:[%s4032_s3 + $0x110] sm:$0xff]  ;;  %v425_v47 = vld [vmem:[%s4032_s3 + $0x118] sm:$0xff] }
  0xb9   : > { %1931 = vperm.xlu1 %2975, %v1797_v49   ;;  %1926 = vperm.xlu0 %2974, %v1796_v50   ;;  %v3000_v48 = vld [vmem:[%s3278_s20 + $0x44] ss:$16 sps:$4 sm:$0xff]  }
  0xba   : > { %v916_v57 = vpack.c.bf16 %v867_v54, %v866_v53  ;;  %v442_v54 = vld [vmem:[%s4032_s3 + $0x1a0] sm:$0xff] }
  0xbb   : > { %v581_v60 = vpop.permute.xlu0 %580  ;;  %v586_v61 = vpop.permute.xlu1 %585 }
  0xbc   : > { %v850_v62 = vmul.f32 %v581_v60, %v402_v55  ;;  %v851_v63 = vmul.f32 %v586_v61, %v403_v56  ;;  %2630 = vmatprep.subr.bf16.mxu0 %v916_v57  ;;  %2938 = vmatprep.subr.bf16.mxu1 %v916_v57  ;;  %v443_v55 = vld [vmem:[%s4032_s3 + $0x1a8] sm:$0xff]  ;;  %v3004_v60 = vld [vmem:[%s3278_s20 + $0x40] ss:$16 sps:$4 sm:$0xff]  }
  0xbd   : > { %1941 = vperm.xlu1 %2975, %v1799_v58   ;;  %1936 = vperm.xlu0 %2974, %v1798_v59   ;;  %v2984_v59 = vld [vmem:[%s3278_s20 + $0x1c0] ss:$16 sps:$4 sm:$0xff]  }
  0xbe   : > { %v908_v2 = vpack.c.bf16 %v851_v63, %v850_v62  ;;  %v2985_v63 = vld [vmem:[%s3278_s20 + $0x1e4] ss:$16 sps:$4 sm:$0xff]  }
  0xbf   : > { %v671_v5 = vpop.permute.xlu0 %670  ;;  %v676_v6 = vpop.permute.xlu1 %675 }
  0xc0   : > { %v868_v7 = vmul.f32 %v671_v5, %v420_v0  ;;  %v869_v8 = vmul.f32 %v676_v6, %v421_v1  ;;  %2631 = vmatpush3.bf16.msra.mxu0 %v908_v2  ;;  %2946 = vmatpush3.bf16.msra.mxu1 %v908_v2  ;;  %v426_v0 = vld [vmem:[%s4032_s3 + $0x120] sm:$0xff]  ;;  %v427_v1 = vld [vmem:[%s4032_s3 + $0x128] sm:$0xff] }
  0xc1   : > { %1951 = vperm.xlu1 %2975, %v1801_v3   ;;  %1946 = vperm.xlu0 %2974, %v1800_v4   ;;  %v3006_v2 = vld [vmem:[%s3278_s20 + $0x64] ss:$16 sps:$4 sm:$0xff]  }
  0xc2   : > { %v917_v11 = vpack.c.bf16 %v869_v8, %v868_v7  ;;  %v444_v8 = vld [vmem:[%s4032_s3 + $0x1b0] sm:$0xff] }
  0xc3   : > { %v591_v14 = vpop.permute.xlu0 %590  ;;  %v596_v15 = vpop.permute.xlu1 %595 }
  0xc4   : > { %v852_v16 = vmul.f32 %v591_v14, %v404_v9  ;;  %v853_v17 = vmul.f32 %v596_v15, %v405_v10  ;;  %2632 = vmatprep.subr.bf16.mxu0 %v917_v11  ;;  %2939 = vmatprep.subr.bf16.mxu1 %v917_v11  ;;  %v445_v9 = vld [vmem:[%s4032_s3 + $0x1b8] sm:$0xff]  ;;  %v3010_v14 = vld [vmem:[%s3278_s20 + $0x60] ss:$16 sps:$4 sm:$0xff]  }
  0xc5   : > { %1961 = vperm.xlu1 %2975, %v1803_v12   ;;  %1956 = vperm.xlu0 %2974, %v1802_v13   ;;  %v2987_v13 = vld [vmem:[%s3278_s20 + $0x1e0] ss:$16 sps:$4 sm:$0xff]  }
  0xc6   : > { %v909_v20 = vpack.c.bf16 %v853_v17, %v852_v16  ;;  %v2993_v17 = vld [vmem:[%s3278_s20 + $0xc] ss:$16 sps:$4 sm:$0xff]  }
  0xc7   : > { %v761_v21 = vpop.permute.xlu0 %760  ;;  %v766_v22 = vpop.permute.xlu1 %765 }
  0xc8   : > { %v886_v25 = vmul.f32 %v761_v21, %v438_v18  ;;  %v887_v26 = vmul.f32 %v766_v22, %v439_v19  ;;  %2633 = vmatpush3.bf16.msra.mxu0 %v909_v20  ;;  %2947 = vmatpush3.bf16.msra.mxu1 %v909_v20  ;;  %v428_v18 = vld [vmem:[%s4032_s3 + $0x130] sm:$0xff]  ;;  %v429_v19 = vld [vmem:[%s4032_s3 + $0x138] sm:$0xff] }
  0xc9   : > { %v3012_v20 = vld [vmem:[%s3278_s20 + $0x84] ss:$16 sps:$4 sm:$0xff]  }
  0xca   : > { %v926_v31 = vpack.c.bf16 %v887_v26, %v886_v25  ;;  %v446_v26 = vld [vmem:[%s4032_s3 + $0x1c0] sm:$0xff] }
  0xcb   : > { %v681_v32 = vpop.permute.xlu0 %680  ;;  %v686_v33 = vpop.permute.xlu1 %685  ;;  %1479 = vmatmul.mubr.bf16.vlgmr.msra.gmra.mrb[0].mxu1 %v2976_v23  ;;  %1383 = vmatmul.mubr.bf16.vlgmr.msra.gmra.mrb[0].mxu0 %v2988_v24 }
  0xcc   : > { %v870_v34 = vmul.f32 %v681_v32, %v422_v28  ;;  %v871_v35 = vmul.f32 %v686_v33, %v423_v29  ;;  %2730 = vmatprep.subr.bf16.mxu1 %v926_v31  ;;  %1486 = vmatprep.mubr.bf16.mxu1 %v2979_v27  ;;  %v447_v27 = vld [vmem:[%s4032_s3 + $0x1c8] sm:$0xff]  ;;  %v3016_v31 = vld [vmem:[%s3278_s20 + $0x80] ss:$16 sps:$4 sm:$0xff]  }
  0xcd   : > { %1390 = vmatprep.mubr.bf16.mxu0 %v2994_v30 }
  0xce   : > { %v918_v38 = vpack.c.bf16 %v871_v35, %v870_v34  ;;  %v3018_v34 = vld [vmem:[%s3278_s20 + $0xa4] ss:$16 sps:$4 sm:$0xff]  }
  0xcf   : > { %v771_v39 = vpop.permute.xlu0 %770  ;;  %v776_v40 = vpop.permute.xlu1 %775  ;;  %v430_v35 = vld [vmem:[%s4032_s3 + $0x140] sm:$0xff] }
  0xd0   : > { %v888_v43 = vmul.f32 %v771_v39, %v440_v36  ;;  %v889_v44 = vmul.f32 %v776_v40, %v441_v37  ;;  %2731 = vmatpush3.bf16.msra.mxu1 %v918_v38  ;;  %v431_v36 = vld [vmem:[%s4032_s3 + $0x148] sm:$0xff] }
  0xd2   : > { %v927_v49 = vpack.c.bf16 %v889_v44, %v888_v43  ;;  %v449_v43 = vld [vmem:[%s4032_s3 + $0x1d8] sm:$0xff] }
  0xd3   : > { %v691_v50 = vpop.permute.xlu0 %690  ;;  %v696_v51 = vpop.permute.xlu1 %695  ;;  %1487 = vmatmul.mubr.bf16.gmra.mrb[4].mxu1 %v2981_v41  ;;  %1391 = vmatmul.mubr.bf16.gmra.mrb[4].mxu0 %v2998_v42  ;;  %v448_v42 = vld [vmem:[%s4032_s3 + $0x1d0] sm:$0xff] }
  0xd4   : > { %v872_v52 = vmul.f32 %v691_v50, %v424_v46  ;;  %v873_v53 = vmul.f32 %v696_v51, %v425_v47  ;;  %2732 = vmatprep.subr.bf16.mxu1 %v927_v49  ;;  %1494 = vmatprep.mubr.bf16.mxu1 %v2982_v45  ;;  %v3022_v47 = vld [vmem:[%s3278_s20 + $0xa0] ss:$16 sps:$4 sm:$0xff]   ;;  %v3024_v50 = vld [vmem:[%s3278_s20 + $0xc4] ss:$16 sps:$4 sm:$0xff]  }
  0xd5   : > { %1398 = vmatprep.mubr.bf16.mxu0 %v3000_v48  ;;  %v432_v51 = vld [vmem:[%s4032_s3 + $0x150] sm:$0xff] }
  0xd6   : > { %v919_v56 = vpack.c.bf16 %v873_v53, %v872_v52  ;;  %v433_v52 = vld [vmem:[%s4032_s3 + $0x158] sm:$0xff] }
  0xd7   : > { %v781_v57 = vpop.permute.xlu0 %780  ;;  %v786_v58 = vpop.permute.xlu1 %785 }
  0xd8   : > { %v890_v61 = vmul.f32 %v781_v57, %v442_v54  ;;  %v891_v62 = vmul.f32 %v786_v58, %v443_v55  ;;  %2733 = vmatpush3.bf16.msra.mxu1 %v919_v56  ;;  %v450_v58 = vld [vmem:[%s4032_s3 + $0x1e0] sm:$0xff] }
  0xda   : > { %v928_v3 = vpack.c.bf16 %v891_v62, %v890_v61 }
  0xdb   : > { %v701_v4 = vpop.permute.xlu0 %700  ;;  %v706_v5 = vpop.permute.xlu1 %705  ;;  %1495 = vmatmul.mubr.bf16.gmra.mrb[8].mxu1 %v2984_v59  ;;  %1399 = vmatmul.mubr.bf16.gmra.mrb[8].mxu0 %v3004_v60  ;;  %v451_v59 = vld [vmem:[%s4032_s3 + $0x1e8] sm:$0xff] }
  0xdc   : > { %v874_v6 = vmul.f32 %v701_v4, %v426_v0  ;;  %v875_v7 = vmul.f32 %v706_v5, %v427_v1  ;;  %2734 = vmatprep.subr.bf16.mxu1 %v928_v3  ;;  %1502 = vmatprep.mubr.bf16.mxu1 %v2985_v63  ;;  %v3028_v63 = vld [vmem:[%s3278_s20 + $0xc0] ss:$16 sps:$4 sm:$0xff]   ;;  %v435_v4 = vld [vmem:[%s4032_s3 + $0x168] sm:$0xff] }
  0xdd   : > { %1406 = vmatprep.mubr.bf16.mxu0 %v3006_v2  ;;  %v3030_v2 = vld [vmem:[%s3278_s20 + $0xe4] ss:$16 sps:$4 sm:$0xff]  }
  0xde   : > { %v920_v10 = vpack.c.bf16 %v875_v7, %v874_v6  ;;  %v434_v3 = vld [vmem:[%s4032_s3 + $0x160] sm:$0xff] }
  0xdf   : > { %v791_v11 = vpop.permute.xlu0 %790  ;;  %v796_v12 = vpop.permute.xlu1 %795 }
  0xe0   : > { %v892_v15 = vmul.f32 %v791_v11, %v444_v8  ;;  %v893_v16 = vmul.f32 %v796_v12, %v445_v9  ;;  %2735 = vmatpush3.bf16.msra.mxu1 %v920_v10  ;;  %v452_v10 = vld [vmem:[%s4032_s3 + $0x1f0] sm:$0xff]  ;;  %v453_v11 = vld [vmem:[%s4032_s3 + $0x1f8] sm:$0xff] }
  0xe2   : > { %v929_v21 = vpack.c.bf16 %v893_v16, %v892_v15  ;;  %v3034_v15 = vld [vmem:[%s3278_s20 + $0xe0] ss:$16 sps:$4 sm:$0xff]  }
  0xe3   : > { %v711_v22 = vpop.permute.xlu0 %710  ;;  %v716_v23 = vpop.permute.xlu1 %715  ;;  %1503 = vmatmul.mubr.bf16.gmra.mrb[12].mxu1 %v2987_v13  ;;  %1407 = vmatmul.mubr.bf16.gmra.mrb[12].mxu0 %v3010_v14 }
  0xe4   : > { %v876_v24 = vmul.f32 %v711_v22, %v428_v18  ;;  %v877_v25 = vmul.f32 %v716_v23, %v429_v19  ;;  %2736 = vmatprep.subr.bf16.mxu1 %v929_v21  ;;  %1543 = vmatprep.mubr.bf16.mxu1 %v2993_v17  ;;  %v3036_v18 = vld [vmem:[%s3278_s20 + $0x104] ss:$16 sps:$4 sm:$0xff]  }
  0xe5   : > { %1414 = vmatprep.mubr.bf16.mxu0 %v3012_v20  ;;  %v436_v19 = vld [vmem:[%s4032_s3 + $0x170] sm:$0xff]  ;;  %v437_v20 = vld [vmem:[%s4032_s3 + $0x178] sm:$0xff] }
  0xe6   : > { %v921_v28 = vpack.c.bf16 %v877_v25, %v876_v24 }
  0xe7   : > { %v801_v29 = vpop.permute.xlu0 %800  ;;  %v806_v30 = vpop.permute.xlu1 %805 }
  0xe8   : > { %v894_v32 = vmul.f32 %v801_v29, %v446_v26  ;;  %v895_v33 = vmul.f32 %v806_v30, %v447_v27  ;;  %2737 = vmatpush3.bf16.msra.mxu1 %v921_v28  ;;  %v2991_v27 = vld [vmem:[%s3278_s20 + $0x8] ss:$16 sps:$4 sm:$0xff]   ;;  %v3040_v28 = vld [vmem:[%s3278_s20 + $0x100] ss:$16 sps:$4 sm:$0xff]   ;;  %v2996_v29 = vld [vmem:[%s3278_s20 + $0x2c] ss:$16 sps:$4 sm:$0xff]  }
  0xe9   : > { %v3042_v30 = vld [vmem:[%s3278_s20 + $0x124] ss:$16 sps:$4 sm:$0xff]  }
  0xea   : > { %v930_v37 = vpack.c.bf16 %v895_v33, %v894_v32  ;;  %v3046_v32 = vld [vmem:[%s3278_s20 + $0x120] ss:$16 sps:$4 sm:$0xff]   ;;  %v3002_v33 = vld [vmem:[%s3278_s20 + $0x4c] ss:$16 sps:$4 sm:$0xff]  }
  0xeb   : > { %v721_v38 = vpop.permute.xlu0 %720  ;;  %v726_v39 = vpop.permute.xlu1 %725  ;;  %1415 = vmatmul.mubr.bf16.gmra.mrb[16].mxu0 %v3016_v31  ;;  %v2999_v31 = vld [vmem:[%s3278_s20 + $0x28] ss:$16 sps:$4 sm:$0xff]  }
  0xec   : > { %v878_v40 = vmul.f32 %v721_v38, %v430_v35  ;;  %v879_v41 = vmul.f32 %v726_v39, %v431_v36  ;;  %2738 = vmatprep.subr.bf16.mxu1 %v930_v37  ;;  %1422 = vmatprep.mubr.bf16.mxu0 %v3018_v34  ;;  %v3048_v34 = vld [vmem:[%s3278_s20 + $0x144] ss:$16 sps:$4 sm:$0xff]   ;;  %v3005_v35 = vld [vmem:[%s3278_s20 + $0x48] ss:$16 sps:$4 sm:$0xff]   ;;  %v3052_v36 = vld [vmem:[%s3278_s20 + $0x140] ss:$16 sps:$4 sm:$0xff]  }
  0xed   : > { %v3008_v37 = vld [vmem:[%s3278_s20 + $0x6c] ss:$16 sps:$4 sm:$0xff]   ;;  %v3054_v38 = vld [vmem:[%s3278_s20 + $0x164] ss:$16 sps:$4 sm:$0xff]   ;;  %v3011_v39 = vld [vmem:[%s3278_s20 + $0x68] ss:$16 sps:$4 sm:$0xff]  }
  0xee   : > { %v922_v44 = vpack.c.bf16 %v879_v41, %v878_v40  ;;  %v3058_v40 = vld [vmem:[%s3278_s20 + $0x160] ss:$16 sps:$4 sm:$0xff]   ;;  %v3014_v41 = vld [vmem:[%s3278_s20 + $0x8c] ss:$16 sps:$4 sm:$0xff]  }
  0xef   : > { %v811_v45 = vpop.permute.xlu0 %810  ;;  %v816_v46 = vpop.permute.xlu1 %815 }
  0xf0   : > { %v896_v48 = vmul.f32 %v811_v45, %v448_v42  ;;  %v897_v49 = vmul.f32 %v816_v46, %v449_v43  ;;  %2739 = vmatpush3.bf16.msra.mxu1 %v922_v44  ;;  %v3017_v42 = vld [vmem:[%s3278_s20 + $0x88] ss:$16 sps:$4 sm:$0xff]   ;;  %v3020_v43 = vld [vmem:[%s3278_s20 + $0xac] ss:$16 sps:$4 sm:$0xff]   ;;  %v1996_v46 = vld [vmem:[%s4033_s4] sm:$0xff] }
  0xf1   : > { %v3023_v44 = vld [vmem:[%s3278_s20 + $0xa8] ss:$16 sps:$4 sm:$0xff]   ;;  %v3026_v45 = vld [vmem:[%s3278_s20 + $0xcc] ss:$16 sps:$4 sm:$0xff]  }
  0xf2   : > { %v931_v53 = vpack.c.bf16 %v897_v49, %v896_v48  ;;  %v3029_v49 = vld [vmem:[%s3278_s20 + $0xc8] ss:$16 sps:$4 sm:$0xff]  }
  0xf3   : > { %v731_v54 = vpop.permute.xlu0 %730  ;;  %v736_v55 = vpop.permute.xlu1 %735  ;;  %1423 = vmatmul.mubr.bf16.gmra.mrb[20].mxu0 %v3022_v47  ;;  %v1997_v47 = vld [vmem:[%s4033_s4 + $0x8] sm:$0xff] }
  0xf4   : > { %v880_v56 = vmul.f32 %v731_v54, %v432_v51  ;;  %v881_v57 = vmul.f32 %v736_v55, %v433_v52  ;;  %2740 = vmatprep.subr.bf16.mxu1 %v931_v53  ;;  %1430 = vmatprep.mubr.bf16.mxu0 %v3024_v50  ;;  %v2928_v48 = vpack.c.bf16 %v1997_v47, %v1996_v46  ;;  %v3032_v50 = vld [vmem:[%s3278_s20 + $0xec] ss:$16 sps:$4 sm:$0xff]   ;;  %v3035_v51 = vld [vmem:[%s3278_s20 + $0xe8] ss:$16 sps:$4 sm:$0xff]  }
  0xf5   : > { %v3038_v52 = vld [vmem:[%s3278_s20 + $0x10c] ss:$16 sps:$4 sm:$0xff]   ;;  %v3041_v53 = vld [vmem:[%s3278_s20 + $0x108] ss:$16 sps:$4 sm:$0xff]  }
  0xf6   : > { %v923_v60 = vpack.c.bf16 %v881_v57, %v880_v56  ;;  %2929 = vmatprep.subr.bf16.mxu0 %v2928_v48  ;;  %v3044_v54 = vld [vmem:[%s3278_s20 + $0x12c] ss:$16 sps:$4 sm:$0xff]   ;;  %v3047_v55 = vld [vmem:[%s3278_s20 + $0x128] ss:$16 sps:$4 sm:$0xff]  }
  0xf7   : > { %v821_v61 = vpop.permute.xlu0 %820  ;;  %v826_v62 = vpop.permute.xlu1 %825  ;;  %2931 = vmatpush3.bf16.msra.mxu0 %v2928_v48  ;;  %v3050_v56 = vld [vmem:[%s3278_s20 + $0x14c] ss:$16 sps:$4 sm:$0xff]   ;;  %v3053_v57 = vld [vmem:[%s3278_s20 + $0x148] ss:$16 sps:$4 sm:$0xff]  }
  0xf8   : > { %v898_v0 = vmul.f32 %v821_v61, %v450_v58  ;;  %v899_v1 = vmul.f32 %v826_v62, %v451_v59  ;;  %2741 = vmatpush3.bf16.msra.mxu1 %v923_v60  ;;  %v3056_v58 = vld [vmem:[%s3278_s20 + $0x16c] ss:$16 sps:$4 sm:$0xff]   ;;  %v3161_v59 = vmov 0.0   ;;  %v3059_v60 = vld [vmem:[%s3278_s20 + $0x168] ss:$16 sps:$4 sm:$0xff]  }
  0xf9   : > { %358 = vst.msk [vmem:[#allocation2] sm:$0xff] %vm357_vm0, %v3161_v59  ;;  %359 = vst.msk [vmem:[#allocation2 + $0x8] sm:$0xff] %vm357_vm0, %v3161_v59  ;;  %v3060_v61 = vld [vmem:[%s3278_s20 + $0x18c] ss:$16 sps:$4 sm:$0xff]   ;;  %v3062_v62 = vld [vmem:[%s3278_s20 + $0x188] ss:$16 sps:$4 sm:$0xff]  }
  0xfa   : > { %v932_v5 = vpack.c.bf16 %v899_v1, %v898_v0  ;;  %360 = vst.msk [vmem:[#allocation2 + $0x10] sm:$0xff] %vm357_vm0, %v3161_v59  ;;  %361 = vst.msk [vmem:[#allocation2 + $0x18] sm:$0xff] %vm357_vm0, %v3161_v59  ;;  %v3065_v0 = vld [vmem:[%s3278_s20 + $0x1a8] ss:$16 sps:$4 sm:$0xff]   ;;  %v3066_v1 = vld [vmem:[%s3278_s20 + $0x1cc] ss:$16 sps:$4 sm:$0xff]  }
  0xfb   : > { %v741_v6 = vpop.permute.xlu0 %740  ;;  %v746_v7 = vpop.permute.xlu1 %745  ;;  %1431 = vmatmul.mubr.bf16.gmra.mrb[24].mxu0 %v3028_v63  ;;  %362 = vst.msk [vmem:[#allocation2 + $0x20] sm:$0xff] %vm357_vm0, %v3161_v59  ;;  %363 = vst.msk [vmem:[#allocation2 + $0x28] sm:$0xff] %vm357_vm0, %v3161_v59  ;;  %v3063_v63 = vld [vmem:[%s3278_s20 + $0x1ac] ss:$16 sps:$4 sm:$0xff]  }
  0xfc   : > { %v882_v8 = vmul.f32 %v741_v6, %v434_v3  ;;  %v883_v9 = vmul.f32 %v746_v7, %v435_v4  ;;  %2742 = vmatprep.subr.bf16.mxu1 %v932_v5  ;;  %1438 = vmatprep.mubr.bf16.mxu0 %v3030_v2  ;;  %364 = vst.msk [vmem:[#allocation2 + $0x30] sm:$0xff] %vm357_vm0, %v3161_v59  ;;  %365 = vst.msk [vmem:[#allocation2 + $0x38] sm:$0xff] %vm357_vm0, %v3161_v59  ;;  %v3068_v2 = vld [vmem:[%s3278_s20 + $0x1c8] ss:$16 sps:$4 sm:$0xff]   ;;  %v3069_v3 = vld [vmem:[%s3278_s20 + $0x1ec] ss:$16 sps:$4 sm:$0xff]  }
  0xfd   : > { %366 = vst.msk [vmem:[#allocation2 + $0x40] sm:$0xff] %vm357_vm0, %v3161_v59  ;;  %367 = vst.msk [vmem:[#allocation2 + $0x48] sm:$0xff] %vm357_vm0, %v3161_v59  ;;  %v3071_v4 = vld [vmem:[%s3278_s20 + $0x1e8] ss:$16 sps:$4 sm:$0xff]  }
  0xfe   : > { %v924_v12 = vpack.c.bf16 %v883_v9, %v882_v8  ;;  %368 = vst.msk [vmem:[#allocation2 + $0x50] sm:$0xff] %vm357_vm0, %v3161_v59  ;;  %369 = vst.msk [vmem:[#allocation2 + $0x58] sm:$0xff] %vm357_vm0, %v3161_v59 }
  0xff   : > { %v831_v13 = vpop.permute.xlu0 %830  ;;  %v836_v14 = vpop.permute.xlu1 %835  ;;  %370 = vst.msk [vmem:[#allocation2 + $0x60] sm:$0xff] %vm357_vm0, %v3161_v59  ;;  %371 = vst.msk [vmem:[#allocation2 + $0x68] sm:$0xff] %vm357_vm0, %v3161_v59 }
 0x100   : > { %v900_v16 = vmul.f32 %v831_v13, %v452_v10  ;;  %v901_v17 = vmul.f32 %v836_v14, %v453_v11  ;;  %2743 = vmatpush3.bf16.msra.mxu1 %v924_v12  ;;  %372 = vst.msk [vmem:[#allocation2 + $0x70] sm:$0xff] %vm357_vm0, %v3161_v59  ;;  %373 = vst.msk [vmem:[#allocation2 + $0x78] sm:$0xff] %vm357_vm0, %v3161_v59 }
 0x101   : > { %374 = vst.msk [vmem:[#allocation2 + $0x80] sm:$0xff] %vm357_vm0, %v3161_v59  ;;  %375 = vst.msk [vmem:[#allocation2 + $0x88] sm:$0xff] %vm357_vm0, %v3161_v59 }
 0x102   : > { %v933_v21 = vpack.c.bf16 %v901_v17, %v900_v16  ;;  %376 = vst.msk [vmem:[#allocation2 + $0x90] sm:$0xff] %vm357_vm0, %v3161_v59  ;;  %377 = vst.msk [vmem:[#allocation2 + $0x98] sm:$0xff] %vm357_vm0, %v3161_v59 }
 0x103   : > { %v751_v22 = vpop.permute.xlu0 %750  ;;  %v756_v23 = vpop.permute.xlu1 %755  ;;  %1439 = vmatmul.mubr.bf16.gmra.mrb[28].mxu0 %v3034_v15  ;;  %378 = vst.msk [vmem:[#allocation2 + $0xa0] sm:$0xff] %vm357_vm0, %v3161_v59  ;;  %379 = vst.msk [vmem:[#allocation2 + $0xa8] sm:$0xff] %vm357_vm0, %v3161_v59 }
 0x104   : > { %v884_v24 = vmul.f32 %v751_v22, %v436_v19  ;;  %v885_v25 = vmul.f32 %v756_v23, %v437_v20  ;;  %2744 = vmatprep.subr.bf16.mxu1 %v933_v21  ;;  %1446 = vmatprep.mubr.bf16.mxu0 %v3036_v18  ;;  %380 = vst.msk [vmem:[#allocation2 + $0xb0] sm:$0xff] %vm357_vm0, %v3161_v59  ;;  %381 = vst.msk [vmem:[#allocation2 + $0xb8] sm:$0xff] %vm357_vm0, %v3161_v59 }
 0x105   : > { %382 = vst.msk [vmem:[#allocation2 + $0xc0] sm:$0xff] %vm357_vm0, %v3161_v59  ;;  %383 = vst.msk [vmem:[#allocation2 + $0xc8] sm:$0xff] %vm357_vm0, %v3161_v59 }
 0x106   : > { %v925_v26 = vpack.c.bf16 %v885_v25, %v884_v24  ;;  %384 = vst.msk [vmem:[#allocation2 + $0xd0] sm:$0xff] %vm357_vm0, %v3161_v59  ;;  %385 = vst.msk [vmem:[#allocation2 + $0xd8] sm:$0xff] %vm357_vm0, %v3161_v59 }
 0x107   : > { %386 = vst.msk [vmem:[#allocation2 + $0xe0] sm:$0xff] %vm357_vm0, %v3161_v59  ;;  %387 = vst.msk [vmem:[#allocation2 + $0xe8] sm:$0xff] %vm357_vm0, %v3161_v59 }
 0x108   : > { %2745 = vmatpush3.bf16.msra.mxu1 %v925_v26  ;;  %388 = vst.msk [vmem:[#allocation2 + $0xf0] sm:$0xff] %vm357_vm0, %v3161_v59  ;;  %389 = vst.msk [vmem:[#allocation2 + $0xf8] sm:$0xff] %vm357_vm0, %v3161_v59 }
 0x10b   : > { %1544 = vmatmul.mubr.bf16.vlgmr.msra.gmra.mrb[16].mxu1 %v2991_v27  ;;  %1447 = vmatmul.mubr.bf16.gmra.mrb[32].mxu0 %v3040_v28 }
 0x10c   : > { %1551 = vmatprep.mubr.bf16.mxu1 %v2996_v29  ;;  %1454 = vmatprep.mubr.bf16.mxu0 %v3042_v30 }
 0x113   : > { %1552 = vmatmul.mubr.bf16.gmra.mrb[20].mxu1 %v2999_v31  ;;  %1455 = vmatmul.mubr.bf16.gmra.mrb[36].mxu0 %v3046_v32 }
 0x114   : > { %1559 = vmatprep.mubr.bf16.mxu1 %v3002_v33  ;;  %1462 = vmatprep.mubr.bf16.mxu0 %v3048_v34 }
 0x11b   : > { %1560 = vmatmul.mubr.bf16.gmra.mrb[24].mxu1 %v3005_v35  ;;  %1463 = vmatmul.mubr.bf16.gmra.mrb[40].mxu0 %v3052_v36 }
 0x11c   : > { %1567 = vmatprep.mubr.bf16.mxu1 %v3008_v37  ;;  %1470 = vmatprep.mubr.bf16.mxu0 %v3054_v38 }
 0x123   : > { %1568 = vmatmul.mubr.bf16.gmra.mrb[28].mxu1 %v3011_v39  ;;  %1471 = vmatmul.mubr.bf16.gmra.mrb[44].mxu0 %v3058_v40 }
 0x124   : > { %1575 = vmatprep.mubr.bf16.mxu1 %v3014_v41 }
 0x12b   : > { %1576 = vmatmul.mubr.bf16.gmra.mrb[32].mxu1 %v3017_v42 }
 0x12c   : > { %1583 = vmatprep.mubr.bf16.mxu1 %v3020_v43 }
 0x133   : > { %1584 = vmatmul.mubr.bf16.gmra.mrb[36].mxu1 %v3023_v44 }
 0x134   : > { %1591 = vmatprep.mubr.bf16.mxu1 %v3026_v45 }
 0x13b   : > { %1592 = vmatmul.mubr.bf16.gmra.mrb[40].mxu1 %v3029_v49 }
 0x13c   : > { %1599 = vmatprep.mubr.bf16.mxu1 %v3032_v50 }
 0x143   : > { %1600 = vmatmul.mubr.bf16.gmra.mrb[44].mxu1 %v3035_v51 }
 0x144   : > { %1607 = vmatprep.mubr.bf16.mxu1 %v3038_v52 }
 0x14b   : > { %1608 = vmatmul.mubr.bf16.gmra.mrb[48].mxu1 %v3041_v53 }
 0x14c   : > { %1615 = vmatprep.mubr.bf16.mxu1 %v3044_v54 }
 0x153   : > { %1616 = vmatmul.mubr.bf16.gmra.mrb[52].mxu1 %v3047_v55 }
 0x154   : > { %1623 = vmatprep.mubr.bf16.mxu1 %v3050_v56 }
 0x15b   : > { %1624 = vmatmul.mubr.bf16.gmra.mrb[56].mxu1 %v3053_v57 }
 0x15c   : > { %1631 = vmatprep.mubr.bf16.mxu1 %v3056_v58 }
 0x163   : > { %1632 = vmatmul.mubr.bf16.gmra.mrb[60].mxu1 %v3059_v60 }
 0x164   : > { %1639 = vmatprep.mubr.bf16.mxu1 %v3060_v61 }
 0x16b   : > { %1640 = vmatmul.mubr.bf16.gmra.mrb[64].mxu1 %v3062_v62 }
 0x16c   : > { %1647 = vmatprep.mubr.bf16.mxu1 %v3063_v63 }
 0x173   : > { %1648 = vmatmul.mubr.bf16.gmra.mrb[68].mxu1 %v3065_v0 }
 0x174   : > { %1655 = vmatprep.mubr.bf16.mxu1 %v3066_v1 }
 0x17b   : > { %1656 = vmatmul.mubr.bf16.gmra.mrb[72].mxu1 %v3068_v2 }
 0x17c   : > { %1663 = vmatprep.mubr.bf16.mxu1 %v3069_v3 }
 0x183   : > { %1664 = vmatmul.mubr.bf16.gmra.mrb[76].mxu1 %v3071_v4 }
 0x19e   : > { %v2706_v5 = vpop.f32.mrb[0].mxu1  ;;  %v2634_v6 = vpop.f32.mrb[0].mxu0 }
 0x19f   : > { %v2707_v7 = vpop.f32.mrb[1].mxu1  ;;  %v2635_v8 = vpop.f32.mrb[1].mxu0 }
 0x1a0   : > { %v3752_v9 = vadd.f32 %v2707_v7, %v2706_v5  ;;  %v2709_v10 = vpop.f32.mrb[2].mxu1  ;;  %v3754_v11 = vadd.f32 %v2635_v8, %v2634_v6  ;;  %v2637_v12 = vpop.f32.mrb[2].mxu0 }
 0x1a1   : > { %v2710_v13 = vpop.f32.mrb[3].mxu1  ;;  %v2638_v14 = vpop.f32.mrb[3].mxu0 }
 0x1a2   : > { %v3756_v15 = vadd.f32 %v2710_v13, %v2709_v10  ;;  %v3758_v16 = vadd.f32 %v2638_v14, %v2637_v12 }
 0x1a6   : > { %v2712_v17 = vpop.f32.mrb[4].mxu1  ;;  %v2640_v18 = vpop.f32.mrb[4].mxu0 }
 0x1a7   : > { %v2713_v19 = vpop.f32.mrb[5].mxu1  ;;  %v2641_v20 = vpop.f32.mrb[5].mxu0 }
 0x1a8   : > { %v3760_v21 = vadd.f32 %v2713_v19, %v2712_v17  ;;  %v2715_v22 = vpop.f32.mrb[6].mxu1  ;;  %v3762_v23 = vadd.f32 %v2641_v20, %v2640_v18  ;;  %v2643_v24 = vpop.f32.mrb[6].mxu0 }
 0x1a9   : > { %v2716_v25 = vpop.f32.mrb[7].mxu1  ;;  %v2644_v26 = vpop.f32.mrb[7].mxu0 }
 0x1aa   : > { %v3764_v27 = vadd.f32 %v2716_v25, %v2715_v22  ;;  %v3766_v28 = vadd.f32 %v2644_v26, %v2643_v24 }
 0x1ae   : > { %v2718_v29 = vpop.f32.mrb[8].mxu1  ;;  %v2646_v30 = vpop.f32.mrb[8].mxu0 }
 0x1af   : > { %v2719_v31 = vpop.f32.mrb[9].mxu1  ;;  %v2647_v32 = vpop.f32.mrb[9].mxu0 }
 0x1b0   : > { %v3768_v33 = vadd.f32 %v2719_v31, %v2718_v29  ;;  %v2721_v34 = vpop.f32.mrb[10].mxu1  ;;  %v3770_v35 = vadd.f32 %v2647_v32, %v2646_v30  ;;  %v2649_v36 = vpop.f32.mrb[10].mxu0  ;;  %v934_v29 = vld [vmem:[#allocation2] sm:$0xff] }
 0x1b1   : > { %v2722_v37 = vpop.f32.mrb[11].mxu1  ;;  %v2650_v38 = vpop.f32.mrb[11].mxu0 }
 0x1b2   : > { %v3772_v39 = vadd.f32 %v2722_v37, %v2721_v34  ;;  %v3774_v40 = vadd.f32 %v2650_v38, %v2649_v36  ;;  %v935_v37 = vld [vmem:[#allocation2 + $0x8] sm:$0xff] }
 0x1b6   : > { %v2724_v41 = vpop.f32.mrb[12].mxu1  ;;  %v2652_v42 = vpop.f32.mrb[12].mxu0 }
 0x1b7   : > { %v2725_v43 = vpop.f32.mrb[13].mxu1  ;;  %v2653_v44 = vpop.f32.mrb[13].mxu0 }
 0x1b8   : > { %v3776_v45 = vadd.f32 %v2725_v43, %v2724_v41  ;;  %v2727_v46 = vpop.f32.mrb[14].mxu1  ;;  %v3778_v47 = vadd.f32 %v2653_v44, %v2652_v42  ;;  %v2655_v48 = vpop.f32.mrb[14].mxu0 }
 0x1b9   : > { %v2728_v49 = vpop.f32.mrb[15].mxu1  ;;  %v2656_v50 = vpop.f32.mrb[15].mxu0 }
 0x1ba   : > { %v3780_v51 = vadd.f32 %v2728_v49, %v2727_v46  ;;  %v3782_v52 = vadd.f32 %v2656_v50, %v2655_v48 }
 0x1be   : > { %v2658_v53 = vpop.f32.mrb[16].mxu0 }
 0x1bf   : > { %v2659_v54 = vpop.f32.mrb[17].mxu0 }
 0x1c0   : > { %v3784_v55 = vadd.f32 %v2659_v54, %v2658_v53  ;;  %v2661_v56 = vpop.f32.mrb[18].mxu0  ;;  %v936_v54 = vld [vmem:[#allocation2 + $0x10] sm:$0xff] }
 0x1c1   : > { %v2662_v57 = vpop.f32.mrb[19].mxu0 }
 0x1c2   : > { %v3786_v58 = vadd.f32 %v2662_v57, %v2661_v56 }
 0x1c6   : > { %v2664_v59 = vpop.f32.mrb[20].mxu0 }
 0x1c7   : > { %v2665_v60 = vpop.f32.mrb[21].mxu0 }
 0x1c8   : > { %v3788_v61 = vadd.f32 %v2665_v60, %v2664_v59  ;;  %v2667_v62 = vpop.f32.mrb[22].mxu0 }
 0x1c9   : > { %v2668_v63 = vpop.f32.mrb[23].mxu0 }
 0x1ca   : > { %v3790_v0 = vadd.f32 %v2668_v63, %v2667_v62  ;;  %v937_v62 = vld [vmem:[#allocation2 + $0x18] sm:$0xff] }
 0x1ce   : > { %v2670_v1 = vpop.f32.mrb[24].mxu0 }
 0x1cf   : > { %v2671_v2 = vpop.f32.mrb[25].mxu0 }
 0x1d0   : > { %v3792_v3 = vadd.f32 %v2671_v2, %v2670_v1  ;;  %v2673_v4 = vpop.f32.mrb[26].mxu0  ;;  %v1812_v2 = vpop.permute.xlu1 %1811 }
 0x1d1   : > { %v2674_v5 = vpop.f32.mrb[27].mxu0 }
 0x1d2   : > { %v3794_v6 = vadd.f32 %v2674_v5, %v2673_v4  ;;  %v1807_v4 = vpop.permute.xlu0 %1806 }
 0x1d6   : > { %v2676_v7 = vpop.f32.mrb[28].mxu0 }
 0x1d7   : > { %v2677_v8 = vpop.f32.mrb[29].mxu0 }
 0x1d8   : > { %v3796_v10 = vadd.f32 %v2677_v8, %v2676_v7  ;;  %v2679_v12 = vpop.f32.mrb[30].mxu0 }
 0x1d9   : > { %v2680_v13 = vpop.f32.mrb[31].mxu0 }
 0x1da   : > { %v3798_v14 = vadd.f32 %v2680_v13, %v2679_v12 }
 0x1de   : > { %v2746_v17 = vpop.f32.mrb[16].mxu1  ;;  %v2682_v18 = vpop.f32.mrb[32].mxu0 }
 0x1df   : > { %v2747_v19 = vpop.f32.mrb[17].mxu1  ;;  %v2683_v20 = vpop.f32.mrb[33].mxu0 }
 0x1e0   : > { %v2748_v22 = vadd.f32 %v2747_v19, %v2746_v17  ;;  %v2749_v24 = vpop.f32.mrb[18].mxu1  ;;  %v3800_v25 = vadd.f32 %v2683_v20, %v2682_v18  ;;  %v2685_v26 = vpop.f32.mrb[34].mxu0 }
 0x1e1   : > { %v2750_v30 = vpop.f32.mrb[19].mxu1  ;;  %v2686_v31 = vpop.f32.mrb[35].mxu0 }
 0x1e2   : > { %v1546_v32 = vadd.f32 %v2748_v22, %v3754_v11  ;;  %v2751_v34 = vadd.f32 %v2750_v30, %v2749_v24  ;;  %v3803_v36 = vadd.f32 %v2686_v31, %v2685_v26  ;;  %v938_v26 = vld [vmem:[#allocation2 + $0x20] sm:$0xff] }
 0x1e4   : > { %v1672_v38 = vadd.f32 %v1546_v32, %v934_v29  ;;  %v1549_v41 = vadd.f32 %v2751_v34, %v3758_v16 }
 0x1e6   : > { %1705 = vst.msk [vmem:[#allocation2] sm:$0xff] %vm357_vm0, %v1672_v38  ;;  %v1673_v42 = vadd.f32 %v1549_v41, %v935_v37  ;;  %v2752_v43 = vpop.f32.mrb[20].mxu1  ;;  %v2688_v44 = vpop.f32.mrb[36].mxu0  ;;  %v939_v37 = vld [vmem:[#allocation2 + $0x28] sm:$0xff] }
 0x1e7   : > { %v2753_v46 = vpop.f32.mrb[21].mxu1  ;;  %v2689_v48 = vpop.f32.mrb[37].mxu0 }
 0x1e8   : > { %1706 = vst.msk [vmem:[#allocation2 + $0x8] sm:$0xff] %vm357_vm0, %v1673_v42  ;;  %v2754_v49 = vadd.f32 %v2753_v46, %v2752_v43  ;;  %v2755_v50 = vpop.f32.mrb[22].mxu1  ;;  %v3808_v53 = vadd.f32 %v2689_v48, %v2688_v44  ;;  %v2691_v11 = vpop.f32.mrb[38].mxu0 }
 0x1e9   : > { %v2756_v56 = vpop.f32.mrb[23].mxu1  ;;  %v2692_v57 = vpop.f32.mrb[39].mxu0 }
 0x1ea   : > { %v1554_v59 = vadd.f32 %v2754_v49, %v3762_v23  ;;  %v2757_v16 = vadd.f32 %v2756_v56, %v2755_v50  ;;  %v3811_v60 = vadd.f32 %v2692_v57, %v2691_v11  ;;  %v1822_v42 = vpop.permute.xlu1 %1821  ;;  %v1817_v43 = vpop.permute.xlu0 %1816 }
 0x1ec   : > { %v1674_v63 = vadd.f32 %v1554_v59, %v936_v54  ;;  %v1557_v1 = vadd.f32 %v2757_v16, %v3766_v28 }
 0x1ed   : > { %v1740_v5 = vld [vmem:[#allocation2] sm:$0xff] }
 0x1ee   : > { %1707 = vst.msk [vmem:[#allocation2 + $0x10] sm:$0xff] %vm357_vm0, %v1674_v63  ;;  %v1675_v7 = vadd.f32 %v1557_v1, %v937_v62  ;;  %v2758_v8 = vpop.f32.mrb[24].mxu1  ;;  %v1964_v12 = vmul.f32 %v1807_v4, %v1740_v5  ;;  %v2694_v13 = vpop.f32.mrb[40].mxu0  ;;  %v940_v62 = vld [vmem:[#allocation2 + $0x30] sm:$0xff] }
 0x1ef   : > { %v2759_v17 = vpop.f32.mrb[25].mxu1  ;;  %v1741_v18 = vld [vmem:[#allocation2 + $0x8] sm:$0xff]  ;;  %v2695_v19 = vpop.f32.mrb[41].mxu0 }
 0x1f0   : > { %1708 = vst.msk [vmem:[#allocation2 + $0x18] sm:$0xff] %vm357_vm0, %v1675_v7  ;;  %v2760_v23 = vadd.f32 %v2759_v17, %v2758_v8  ;;  %v2761_v20 = vpop.f32.mrb[26].mxu1  ;;  %2880 = vmatprep.mubr.msk.f32.mxu0 %vm357_vm0, %v1964_v12  ;;  %v1965_v22 = vmul.f32 %v1812_v2, %v1741_v18  ;;  %v3817_v28 = vadd.f32 %v2695_v19, %v2694_v13  ;;  %v2697_v24 = vpop.f32.mrb[42].mxu0  ;;  %v941_v7 = vld [vmem:[#allocation2 + $0x38] sm:$0xff] }
 0x1f1   : > { %v2762_v29 = vpop.f32.mrb[27].mxu1  ;;  %v2698_v30 = vpop.f32.mrb[43].mxu0 }
 0x1f2   : > { %v1562_v31 = vadd.f32 %v2760_v23, %v3770_v35  ;;  %v2763_v32 = vadd.f32 %v2762_v29, %v2761_v20  ;;  %2881 = vmatmul.mubr.msk.f32.vlgmr.msra.gmra.mrb[48].mxu0 %vm357_vm0, %v1965_v22  ;;  %v3821_v34 = vadd.f32 %v2698_v30, %v2697_v24  ;;  %v1827_v13 = vpop.permute.xlu0 %1826  ;;  %v1832_v20 = vpop.permute.xlu1 %1831  ;;  %v942_v30 = vld [vmem:[#allocation2 + $0x40] sm:$0xff] }
 0x1f4   : > { %v1676_v38 = vadd.f32 %v1562_v31, %v938_v26  ;;  %v1565_v41 = vadd.f32 %v2763_v32, %v3774_v40 }
 0x1f5   : > { %v1742_v44 = vld [vmem:[#allocation2 + $0x10] sm:$0xff] }
 0x1f6   : > { %1709 = vst.msk [vmem:[#allocation2 + $0x20] sm:$0xff] %vm357_vm0, %v1676_v38  ;;  %v1677_v46 = vadd.f32 %v1565_v41, %v939_v37  ;;  %v2764_v48 = vpop.f32.mrb[28].mxu1  ;;  %v1966_v49 = vmul.f32 %v1817_v43, %v1742_v44  ;;  %v2700_v50 = vpop.f32.mrb[44].mxu0  ;;  %v943_v37 = vld [vmem:[#allocation2 + $0x48] sm:$0xff] }
 0x1f7   : > { %v2765_v11 = vpop.f32.mrb[29].mxu1  ;;  %v1743_v35 = vld [vmem:[#allocation2 + $0x18] sm:$0xff]  ;;  %v2701_v54 = vpop.f32.mrb[45].mxu0 }
 0x1f8   : > { %1710 = vst.msk [vmem:[#allocation2 + $0x28] sm:$0xff] %vm357_vm0, %v1677_v46  ;;  %v2766_v56 = vadd.f32 %v2765_v11, %v2764_v48  ;;  %v2767_v57 = vpop.f32.mrb[30].mxu1  ;;  %2883 = vmatprep.mubr.msk.f32.mxu0 %vm357_vm0, %v1966_v49  ;;  %v1967_v59 = vmul.f32 %v1822_v42, %v1743_v35  ;;  %v3827_v40 = vadd.f32 %v2701_v54, %v2700_v50  ;;  %v2703_v16 = vpop.f32.mrb[46].mxu0 }
 0x1f9   : > { %v2768_v63 = vpop.f32.mrb[31].mxu1  ;;  %v2704_v1 = vpop.f32.mrb[47].mxu0 }
 0x1fa   : > { %v1570_v2 = vadd.f32 %v2766_v56, %v3778_v47  ;;  %v2769_v4 = vadd.f32 %v2768_v63, %v2767_v57  ;;  %2884 = vmatmul.mubr.msk.f32.gmra.mrb[50].mxu0 %vm357_vm0, %v1967_v59  ;;  %v3831_v5 = vadd.f32 %v2704_v1, %v2703_v16  ;;  %v1837_v42 = vpop.permute.xlu0 %1836  ;;  %v1842_v49 = vpop.permute.xlu1 %1841  ;;  %v944_v56 = vld [vmem:[#allocation2 + $0x50] sm:$0xff]  ;;  %v945_v16 = vld [vmem:[#allocation2 + $0x58] sm:$0xff] }
 0x1fc   : > { %v1678_v8 = vadd.f32 %v1570_v2, %v940_v62  ;;  %v1573_v12 = vadd.f32 %v2769_v4, %v3782_v52 }
 0x1fd   : > { %v1744_v17 = vld [vmem:[#allocation2 + $0x20] sm:$0xff] }
 0x1fe   : > { %1711 = vst.msk [vmem:[#allocation2 + $0x30] sm:$0xff] %vm357_vm0, %v1678_v8  ;;  %v1679_v18 = vadd.f32 %v1573_v12, %v941_v7  ;;  %v2770_v19 = vpop.f32.mrb[32].mxu1  ;;  %v1968_v23 = vmul.f32 %v1827_v13, %v1744_v17  ;;  %v1847_v1 = vpop.permute.xlu0 %1846 }
 0x1ff   : > { %v2771_v22 = vpop.f32.mrb[33].mxu1  ;;  %v1745_v24 = vld [vmem:[#allocation2 + $0x28] sm:$0xff]  ;;  %v1852_v12 = vpop.permute.xlu1 %1851 }
 0x200   : > { %1712 = vst.msk [vmem:[#allocation2 + $0x38] sm:$0xff] %vm357_vm0, %v1679_v18  ;;  %v2772_v47 = vadd.f32 %v2771_v22, %v2770_v19  ;;  %v2773_v26 = vpop.f32.mrb[34].mxu1  ;;  %2886 = vmatprep.mubr.msk.f32.mxu0 %vm357_vm0, %v1968_v23  ;;  %v1969_v29 = vmul.f32 %v1832_v20, %v1745_v24  ;;  %v946_v23 = vld [vmem:[#allocation2 + $0x60] sm:$0xff]  ;;  %v947_v24 = vld [vmem:[#allocation2 + $0x68] sm:$0xff] }
 0x201   : > { %v2774_v31 = vpop.f32.mrb[35].mxu1 }
 0x202   : > { %v1578_v52 = vadd.f32 %v2772_v47, %v3784_v55  ;;  %v2775_v32 = vadd.f32 %v2774_v31, %v2773_v26  ;;  %2887 = vmatmul.mubr.msk.f32.gmra.mrb[52].mxu0 %vm357_vm0, %v1969_v29  ;;  %v1857_v29 = vpop.permute.xlu0 %1856 }
 0x204   : > { %v1680_v38 = vadd.f32 %v1578_v52, %v942_v30  ;;  %v1581_v41 = vadd.f32 %v2775_v32, %v3786_v58 }
 0x205   : > { %v1746_v43 = vld [vmem:[#allocation2 + $0x30] sm:$0xff] }
 0x206   : > { %1713 = vst.msk [vmem:[#allocation2 + $0x40] sm:$0xff] %vm357_vm0, %v1680_v38  ;;  %v1681_v44 = vadd.f32 %v1581_v41, %v943_v37  ;;  %v2776_v46 = vpop.f32.mrb[36].mxu1  ;;  %v1970_v48 = vmul.f32 %v1837_v42, %v1746_v43  ;;  %v1862_v37 = vpop.permute.xlu1 %1861 }
 0x207   : > { %v2777_v50 = vpop.f32.mrb[37].mxu1  ;;  %v1747_v11 = vld [vmem:[#allocation2 + $0x38] sm:$0xff] }
 0x208   : > { %1714 = vst.msk [vmem:[#allocation2 + $0x48] sm:$0xff] %vm357_vm0, %v1681_v44  ;;  %v2778_v55 = vadd.f32 %v2777_v50, %v2776_v46  ;;  %v2779_v35 = vpop.f32.mrb[38].mxu1  ;;  %2889 = vmatprep.mubr.msk.f32.mxu0 %vm357_vm0, %v1970_v48  ;;  %v1971_v54 = vmul.f32 %v1842_v49, %v1747_v11  ;;  %v948_v44 = vld [vmem:[#allocation2 + $0x70] sm:$0xff]  ;;  %v949_v49 = vld [vmem:[#allocation2 + $0x78] sm:$0xff] }
 0x209   : > { %v2780_v57 = vpop.f32.mrb[39].mxu1 }
 0x20a   : > { %v1586_v58 = vadd.f32 %v2778_v55, %v3788_v61  ;;  %v2781_v59 = vadd.f32 %v2780_v57, %v2779_v35  ;;  %2890 = vmatmul.mubr.msk.f32.gmra.mrb[54].mxu0 %vm357_vm0, %v1971_v54  ;;  %v1867_v55 = vpop.permute.xlu0 %1866 }
 0x20c   : > { %v1682_v62 = vadd.f32 %v1586_v58, %v944_v56  ;;  %v1589_v63 = vadd.f32 %v2781_v59, %v3790_v0  ;;  %v1872_v58 = vpop.permute.xlu1 %1871 }
 0x20d   : > { %v1748_v2 = vld [vmem:[#allocation2 + $0x40] sm:$0xff] }
 0x20e   : > { %1715 = vst.msk [vmem:[#allocation2 + $0x50] sm:$0xff] %vm357_vm0, %v1682_v62  ;;  %v1683_v4 = vadd.f32 %v1589_v63, %v945_v16  ;;  %v2782_v7 = vpop.f32.mrb[40].mxu1  ;;  %v1972_v8 = vmul.f32 %v1847_v1, %v1748_v2  ;;  %v950_v1 = vld [vmem:[#allocation2 + $0x80] sm:$0xff] }
 0x20f   : > { %v2783_v13 = vpop.f32.mrb[41].mxu1  ;;  %v1749_v17 = vld [vmem:[#allocation2 + $0x48] sm:$0xff] }
 0x210   : > { %1716 = vst.msk [vmem:[#allocation2 + $0x58] sm:$0xff] %vm357_vm0, %v1683_v4  ;;  %v2784_v61 = vadd.f32 %v2783_v13, %v2782_v7  ;;  %v2785_v18 = vpop.f32.mrb[42].mxu1  ;;  %2892 = vmatprep.mubr.msk.f32.mxu0 %vm357_vm0, %v1972_v8  ;;  %v1973_v19 = vmul.f32 %v1852_v12, %v1749_v17  ;;  %v951_v7 = vld [vmem:[#allocation2 + $0x88] sm:$0xff]  ;;  %v1877_v13 = vpop.permute.xlu0 %1876 }
 0x211   : > { %v2786_v20 = vpop.f32.mrb[43].mxu1 }
 0x212   : > { %v1594_v0 = vadd.f32 %v2784_v61, %v3792_v3  ;;  %v2787_v22 = vadd.f32 %v2786_v20, %v2785_v18  ;;  %2893 = vmatmul.mubr.msk.f32.gmra.mrb[56].mxu0 %vm357_vm0, %v1973_v19 }
 0x214   : > { %v1684_v47 = vadd.f32 %v1594_v0, %v946_v23  ;;  %v1597_v26 = vadd.f32 %v2787_v22, %v3794_v6  ;;  %v1882_v23 = vpop.permute.xlu1 %1881 }
 0x215   : > { %v1750_v30 = vld [vmem:[#allocation2 + $0x50] sm:$0xff] }
 0x216   : > { %1717 = vst.msk [vmem:[#allocation2 + $0x60] sm:$0xff] %vm357_vm0, %v1684_v47  ;;  %v1685_v31 = vadd.f32 %v1597_v26, %v947_v24  ;;  %v2788_v52 = vpop.f32.mrb[44].mxu1  ;;  %v1974_v32 = vmul.f32 %v1857_v29, %v1750_v30  ;;  %v952_v47 = vld [vmem:[#allocation2 + $0x90] sm:$0xff]  ;;  %v953_v30 = vld [vmem:[#allocation2 + $0x98] sm:$0xff] }
 0x217   : > { %v2789_v38 = vpop.f32.mrb[45].mxu1  ;;  %v1751_v41 = vld [vmem:[#allocation2 + $0x58] sm:$0xff] }
 0x218   : > { %1718 = vst.msk [vmem:[#allocation2 + $0x68] sm:$0xff] %vm357_vm0, %v1685_v31  ;;  %v2790_v3 = vadd.f32 %v2789_v38, %v2788_v52  ;;  %v2791_v42 = vpop.f32.mrb[46].mxu1  ;;  %2895 = vmatprep.mubr.msk.f32.mxu0 %vm357_vm0, %v1974_v32  ;;  %v1975_v43 = vmul.f32 %v1862_v37, %v1751_v41  ;;  %v1887_v32 = vpop.permute.xlu0 %1886 }
 0x219   : > { %v2792_v46 = vpop.f32.mrb[47].mxu1 }
 0x21a   : > { %v1602_v6 = vadd.f32 %v2790_v3, %v3796_v10  ;;  %v2793_v48 = vadd.f32 %v2792_v46, %v2791_v42  ;;  %2896 = vmatmul.mubr.msk.f32.gmra.mrb[58].mxu0 %vm357_vm0, %v1975_v43  ;;  %v1892_v42 = vpop.permute.xlu1 %1891 }
 0x21c   : > { %v1686_v50 = vadd.f32 %v1602_v6, %v948_v44  ;;  %v1605_v11 = vadd.f32 %v2793_v48, %v3798_v14  ;;  %v954_v48 = vld [vmem:[#allocation2 + $0xa0] sm:$0xff] }
 0x21d   : > { %v1752_v35 = vld [vmem:[#allocation2 + $0x60] sm:$0xff] }
 0x21e   : > { %1719 = vst.msk [vmem:[#allocation2 + $0x70] sm:$0xff] %vm357_vm0, %v1686_v50  ;;  %v1687_v54 = vadd.f32 %v1605_v11, %v949_v49  ;;  %v2794_v56 = vpop.f32.mrb[48].mxu1  ;;  %v1976_v57 = vmul.f32 %v1867_v55, %v1752_v35  ;;  %v955_v11 = vld [vmem:[#allocation2 + $0xa8] sm:$0xff] }
 0x21f   : > { %v2795_v59 = vpop.f32.mrb[49].mxu1  ;;  %v1753_v16 = vld [vmem:[#allocation2 + $0x68] sm:$0xff] }
 0x220   : > { %1720 = vst.msk [vmem:[#allocation2 + $0x78] sm:$0xff] %vm357_vm0, %v1687_v54  ;;  %v2796_v10 = vadd.f32 %v2795_v59, %v2794_v56  ;;  %v2797_v62 = vpop.f32.mrb[50].mxu1  ;;  %2898 = vmatprep.mubr.msk.f32.mxu0 %vm357_vm0, %v1976_v57  ;;  %v1977_v63 = vmul.f32 %v1872_v58, %v1753_v16  ;;  %v1897_v54 = vpop.permute.xlu0 %1896 }
 0x221   : > { %v2798_v2 = vpop.f32.mrb[51].mxu1  ;;  %v1902_v16 = vpop.permute.xlu1 %1901 }
 0x222   : > { %v1610_v14 = vadd.f32 %v2796_v10, %v3800_v25  ;;  %v2799_v4 = vadd.f32 %v2798_v2, %v2797_v62  ;;  %2899 = vmatmul.mubr.msk.f32.gmra.mrb[60].mxu0 %vm357_vm0, %v1977_v63  ;;  %v956_v2 = vld [vmem:[#allocation2 + $0xb0] sm:$0xff] }
 0x224   : > { %v1688_v8 = vadd.f32 %v1610_v14, %v950_v1  ;;  %v1613_v12 = vadd.f32 %v2799_v4, %v3803_v36 }
 0x225   : > { %v1754_v17 = vld [vmem:[#allocation2 + $0x70] sm:$0xff] }
 0x226   : > { %1721 = vst.msk [vmem:[#allocation2 + $0x80] sm:$0xff] %vm357_vm0, %v1688_v8  ;;  %v1689_v61 = vadd.f32 %v1613_v12, %v951_v7  ;;  %v2800_v18 = vpop.f32.mrb[52].mxu1  ;;  %v1978_v19 = vmul.f32 %v1877_v13, %v1754_v17  ;;  %v957_v7 = vld [vmem:[#allocation2 + $0xb8] sm:$0xff]  ;;  %v1907_v13 = vpop.permute.xlu0 %1906 }
 0x227   : > { %v2801_v20 = vpop.f32.mrb[53].mxu1  ;;  %v1755_v0 = vld [vmem:[#allocation2 + $0x78] sm:$0xff] }
 0x228   : > { %1722 = vst.msk [vmem:[#allocation2 + $0x88] sm:$0xff] %vm357_vm0, %v1689_v61  ;;  %v2802_v25 = vadd.f32 %v2801_v20, %v2800_v18  ;;  %v2803_v22 = vpop.f32.mrb[54].mxu1  ;;  %2901 = vmatprep.mubr.msk.f32.mxu0 %vm357_vm0, %v1978_v19  ;;  %v1979_v24 = vmul.f32 %v1882_v23, %v1755_v0  ;;  %v1912_v23 = vpop.permute.xlu1 %1911 }
 0x229   : > { %v2804_v26 = vpop.f32.mrb[55].mxu1 }
 0x22a   : > { %v1618_v36 = vadd.f32 %v2802_v25, %v3808_v53  ;;  %v2805_v29 = vadd.f32 %v2804_v26, %v2803_v22  ;;  %2902 = vmatmul.mubr.msk.f32.gmra.mrb[62].mxu0 %vm357_vm0, %v1979_v24  ;;  %v958_v24 = vld [vmem:[#allocation2 + $0xc0] sm:$0xff] }
 0x22c   : > { %v1690_v31 = vadd.f32 %v1618_v36, %v952_v47  ;;  %v1621_v52 = vadd.f32 %v2805_v29, %v3811_v60  ;;  %v959_v36 = vld [vmem:[#allocation2 + $0xc8] sm:$0xff] }
 0x22d   : > { %v1756_v37 = vld [vmem:[#allocation2 + $0x80] sm:$0xff] }
 0x22e   : > { %1723 = vst.msk [vmem:[#allocation2 + $0x90] sm:$0xff] %vm357_vm0, %v1690_v31  ;;  %v1691_v38 = vadd.f32 %v1621_v52, %v953_v30  ;;  %v2806_v41 = vpop.f32.mrb[56].mxu1  ;;  %v1980_v3 = vmul.f32 %v1887_v32, %v1756_v37  ;;  %v1917_v31 = vpop.permute.xlu0 %1916 }
 0x22f   : > { %v2807_v43 = vpop.f32.mrb[57].mxu1  ;;  %v1757_v44 = vld [vmem:[#allocation2 + $0x88] sm:$0xff] }
 0x230   : > { %1724 = vst.msk [vmem:[#allocation2 + $0x98] sm:$0xff] %vm357_vm0, %v1691_v38  ;;  %v2808_v53 = vadd.f32 %v2807_v43, %v2806_v41  ;;  %v2809_v46 = vpop.f32.mrb[58].mxu1  ;;  %2904 = vmatprep.mubr.msk.f32.mxu0 %vm357_vm0, %v1980_v3  ;;  %v1981_v6 = vmul.f32 %v1892_v42, %v1757_v44  ;;  %v1922_v41 = vpop.permute.xlu1 %1921 }
 0x231   : > { %v2810_v49 = vpop.f32.mrb[59].mxu1 }
 0x232   : > { %v1626_v60 = vadd.f32 %v2808_v53, %v3817_v28  ;;  %v2811_v50 = vadd.f32 %v2810_v49, %v2809_v46  ;;  %2905 = vmatmul.mubr.msk.f32.gmra.mrb[64].mxu0 %vm357_vm0, %v1981_v6  ;;  %v960_v53 = vld [vmem:[#allocation2 + $0xd0] sm:$0xff] }
 0x234   : > { %v1692_v55 = vadd.f32 %v1626_v60, %v954_v48  ;;  %v1629_v35 = vadd.f32 %v2811_v50, %v3821_v34  ;;  %v961_v48 = vld [vmem:[#allocation2 + $0xd8] sm:$0xff]  ;;  %v1927_v50 = vpop.permute.xlu0 %1926 }
 0x235   : > { %v1758_v56 = vld [vmem:[#allocation2 + $0x90] sm:$0xff] }
 0x236   : > { %1725 = vst.msk [vmem:[#allocation2 + $0xa0] sm:$0xff] %vm357_vm0, %v1692_v55  ;;  %v1693_v57 = vadd.f32 %v1629_v35, %v955_v11  ;;  %v2812_v58 = vpop.f32.mrb[60].mxu1  ;;  %v1982_v59 = vmul.f32 %v1897_v54, %v1758_v56  ;;  %v1932_v56 = vpop.permute.xlu1 %1931 }
 0x237   : > { %v2813_v10 = vpop.f32.mrb[61].mxu1  ;;  %v1759_v62 = vld [vmem:[#allocation2 + $0x98] sm:$0xff] }
 0x238   : > { %1726 = vst.msk [vmem:[#allocation2 + $0xa8] sm:$0xff] %vm357_vm0, %v1693_v57  ;;  %v2814_v28 = vadd.f32 %v2813_v10, %v2812_v58  ;;  %v2815_v63 = vpop.f32.mrb[62].mxu1  ;;  %2907 = vmatprep.mubr.msk.f32.mxu0 %vm357_vm0, %v1982_v59  ;;  %v1983_v1 = vmul.f32 %v1902_v16, %v1759_v62  ;;  %v962_v10 = vld [vmem:[#allocation2 + $0xe0] sm:$0xff] }
 0x239   : > { %v2816_v14 = vpop.f32.mrb[63].mxu1 }
 0x23a   : > { %v1634_v34 = vadd.f32 %v2814_v28, %v3827_v40  ;;  %v2817_v4 = vadd.f32 %v2816_v14, %v2815_v63  ;;  %2908 = vmatmul.mubr.msk.f32.gmra.mrb[66].mxu0 %vm357_vm0, %v1983_v1  ;;  %v963_v63 = vld [vmem:[#allocation2 + $0xe8] sm:$0xff]  ;;  %v1937_v14 = vpop.permute.xlu0 %1936 }
 0x23c   : > { %v1694_v8 = vadd.f32 %v1634_v34, %v956_v2  ;;  %v1637_v12 = vadd.f32 %v2817_v4, %v3831_v5 }
 0x23d   : > { %v1760_v17 = vld [vmem:[#allocation2 + $0xa0] sm:$0xff] }
 0x23e   : > { %1727 = vst.msk [vmem:[#allocation2 + $0xb0] sm:$0xff] %vm357_vm0, %v1694_v8  ;;  %v1695_v61 = vadd.f32 %v1637_v12, %v957_v7  ;;  %v2818_v18 = vpop.f32.mrb[64].mxu1  ;;  %v1984_v19 = vmul.f32 %v1907_v13, %v1760_v17  ;;  %v1942_v12 = vpop.permute.xlu1 %1941 }
 0x23f   : > { %v2819_v20 = vpop.f32.mrb[65].mxu1  ;;  %v1761_v0 = vld [vmem:[#allocation2 + $0xa8] sm:$0xff] }
 0x240   : > { %1728 = vst.msk [vmem:[#allocation2 + $0xb8] sm:$0xff] %vm357_vm0, %v1695_v61  ;;  %v2820_v40 = vadd.f32 %v2819_v20, %v2818_v18  ;;  %v2821_v25 = vpop.f32.mrb[66].mxu1  ;;  %2910 = vmatprep.mubr.msk.f32.mxu0 %vm357_vm0, %v1984_v19  ;;  %v1985_v22 = vmul.f32 %v1912_v23, %v1761_v0  ;;  %v964_v19 = vld [vmem:[#allocation2 + $0xf0] sm:$0xff]  ;;  %v965_v0 = vld [vmem:[#allocation2 + $0xf8] sm:$0xff] }
 0x241   : > { %v2822_v47 = vpop.f32.mrb[67].mxu1 }
 0x242   : > { %v1642_v5 = vadd.f32 %v2820_v40, %v3752_v9  ;;  %v2823_v26 = vadd.f32 %v2822_v47, %v2821_v25  ;;  %2911 = vmatmul.mubr.msk.f32.gmra.mrb[68].mxu0 %vm357_vm0, %v1985_v22  ;;  %v1947_v22 = vpop.permute.xlu0 %1946 }
 0x244   : > { %v1696_v29 = vadd.f32 %v1642_v5, %v958_v24  ;;  %v1645_v30 = vadd.f32 %v2823_v26, %v3756_v15  ;;  %v1952_v26 = vpop.permute.xlu1 %1951 }
 0x245   : > { %v1762_v52 = vld [vmem:[#allocation2 + $0xb0] sm:$0xff] }
 0x246   : > { %1729 = vst.msk [vmem:[#allocation2 + $0xc0] sm:$0xff] %vm357_vm0, %v1696_v29  ;;  %v1697_v32 = vadd.f32 %v1645_v30, %v959_v36  ;;  %v2824_v37 = vpop.f32.mrb[68].mxu1  ;;  %v1986_v38 = vmul.f32 %v1917_v31, %v1762_v52  ;;  %v1957_v29 = vpop.permute.xlu0 %1956 }
 0x247   : > { %v2825_v3 = vpop.f32.mrb[69].mxu1  ;;  %v1763_v42 = vld [vmem:[#allocation2 + $0xb8] sm:$0xff] }
 0x248   : > { %1730 = vst.msk [vmem:[#allocation2 + $0xc8] sm:$0xff] %vm357_vm0, %v1697_v32  ;;  %v2826_v9 = vadd.f32 %v2825_v3, %v2824_v37  ;;  %v2827_v43 = vpop.f32.mrb[70].mxu1  ;;  %2913 = vmatprep.mubr.msk.f32.mxu0 %vm357_vm0, %v1986_v38  ;;  %v1987_v44 = vmul.f32 %v1922_v41, %v1763_v42  ;;  %v1962_v52 = vpop.permute.xlu1 %1961  ;;  %v3915_v37 = vld [vmem:[%s4034_s5] ss:$0 sm:$0xff] }
 0x249   : > { %v2828_v46 = vpop.f32.mrb[71].mxu1 }
 0x24a   : > { %v1650_v15 = vadd.f32 %v2826_v9, %v3760_v21  ;;  %v2829_v6 = vadd.f32 %v2828_v46, %v2827_v43  ;;  %2914 = vmatmul.mubr.msk.f32.gmra.mrb[70].mxu0 %vm357_vm0, %v1987_v44 }
 0x24c   : > { %v1698_v49 = vadd.f32 %v1650_v15, %v960_v53  ;;  %v1653_v60 = vadd.f32 %v2829_v6, %v3764_v27 }
 0x24d   : > { %v1764_v11 = vld [vmem:[#allocation2 + $0xc0] sm:$0xff] }
 0x24e   : > { %1731 = vst.msk [vmem:[#allocation2 + $0xd0] sm:$0xff] %vm357_vm0, %v1698_v49  ;;  %v1699_v55 = vadd.f32 %v1653_v60, %v961_v48  ;;  %v2830_v35 = vpop.f32.mrb[72].mxu1  ;;  %v1988_v54 = vmul.f32 %v1927_v50, %v1764_v11 }
 0x24f   : > { %v2831_v57 = vpop.f32.mrb[73].mxu1  ;;  %v1765_v58 = vld [vmem:[#allocation2 + $0xc8] sm:$0xff] }
 0x250   : > { %1732 = vst.msk [vmem:[#allocation2 + $0xd8] sm:$0xff] %vm357_vm0, %v1699_v55  ;;  %v2832_v21 = vadd.f32 %v2831_v57, %v2830_v35  ;;  %v2833_v59 = vpop.f32.mrb[74].mxu1  ;;  %2916 = vmatprep.mubr.msk.f32.mxu0 %vm357_vm0, %v1988_v54  ;;  %v1989_v16 = vmul.f32 %v1932_v56, %v1765_v58 }
 0x251   : > { %v2834_v62 = vpop.f32.mrb[75].mxu1 }
 0x252   : > { %v1658_v27 = vadd.f32 %v2832_v21, %v3768_v33  ;;  %v2835_v28 = vadd.f32 %v2834_v62, %v2833_v59  ;;  %2917 = vmatmul.mubr.msk.f32.gmra.mrb[72].mxu0 %vm357_vm0, %v1989_v16 }
 0x254   : > { %v1700_v1 = vadd.f32 %v1658_v27, %v962_v10  ;;  %v1661_v2 = vadd.f32 %v2835_v28, %v3772_v39 }
 0x255   : > { %v1766_v34 = vld [vmem:[#allocation2 + $0xd0] sm:$0xff] }
 0x256   : > { %1733 = vst.msk [vmem:[#allocation2 + $0xe0] sm:$0xff] %vm357_vm0, %v1700_v1  ;;  %v1701_v4 = vadd.f32 %v1661_v2, %v963_v63  ;;  %v2836_v7 = vpop.f32.mrb[76].mxu1  ;;  %v1990_v8 = vmul.f32 %v1937_v14, %v1766_v34 }
 0x257   : > { %v2837_v13 = vpop.f32.mrb[77].mxu1  ;;  %v1767_v17 = vld [vmem:[#allocation2 + $0xd8] sm:$0xff] }
 0x258   : > { %1734 = vst.msk [vmem:[#allocation2 + $0xe8] sm:$0xff] %vm357_vm0, %v1701_v4  ;;  %v2838_v33 = vadd.f32 %v2837_v13, %v2836_v7  ;;  %v2839_v61 = vpop.f32.mrb[78].mxu1  ;;  %2919 = vmatprep.mubr.msk.f32.mxu0 %vm357_vm0, %v1990_v8  ;;  %v1991_v18 = vmul.f32 %v1942_v12, %v1767_v17 }
 0x259   : > { %v2840_v23 = vpop.f32.mrb[79].mxu1 }
 0x25a   : > { %v1666_v39 = vadd.f32 %v2838_v33, %v3776_v45  ;;  %v2841_v20 = vadd.f32 %v2840_v23, %v2839_v61  ;;  %2920 = vmatmul.mubr.msk.f32.gmra.mrb[74].mxu0 %vm357_vm0, %v1991_v18 }
 0x25c   : > { %v1702_v40 = vadd.f32 %v1666_v39, %v964_v19  ;;  %v1669_v25 = vadd.f32 %v2841_v20, %v3780_v51 }
 0x25d   : > { %v1768_v24 = vld [vmem:[#allocation2 + $0xe0] sm:$0xff] }
 0x25e   : > { %1735 = vst.msk [vmem:[#allocation2 + $0xf0] sm:$0xff] %vm357_vm0, %v1702_v40  ;;  %v1703_v47 = vadd.f32 %v1669_v25, %v965_v0  ;;  %v1992_v5 = vmul.f32 %v1947_v22, %v1768_v24 }
 0x25f   : > { %v1769_v36 = vld [vmem:[#allocation2 + $0xe8] sm:$0xff] }
 0x260   : > { %1736 = vst.msk [vmem:[#allocation2 + $0xf8] sm:$0xff] %vm357_vm0, %v1703_v47  ;;  %2922 = vmatprep.mubr.msk.f32.mxu0 %vm357_vm0, %v1992_v5  ;;  %v1993_v45 = vmul.f32 %v1952_v26, %v1769_v36 }
 0x262   : > { %2923 = vmatmul.mubr.msk.f32.gmra.mrb[76].mxu0 %vm357_vm0, %v1993_v45 }
 0x265   : > { %v1770_v30 = vld [vmem:[#allocation2 + $0xf0] sm:$0xff] }
 0x266   : > { %v1994_v31 = vmul.f32 %v1957_v29, %v1770_v30 }
 0x267   : > { %v1771_v51 = vld [vmem:[#allocation2 + $0xf8] sm:$0xff] }
 0x268   : > { %2925 = vmatprep.mubr.msk.f32.mxu0 %vm357_vm0, %v1994_v31  ;;  %v1995_v32 = vmul.f32 %v1962_v52, %v1771_v51 }
 0x26a   : > { %2926 = vmatmul.mubr.msk.f32.gmra.mrb[78].mxu0 %vm357_vm0, %v1995_v32 }
 0x2c5   : > { %v2882_v38 = vpop.f32.mrb[48].mxu0 }
 0x2c6   : > { %v2173_v41 = vadd.f32 %v2882_v38, %v3915_v37  ;;  %v2167_v3 = vpop.f32.mrb[49].mxu0 }
 0x2c7   : > { %v2168_v42 = vadd.f32 %v3915_v37, %v2167_v3 }
 0x2c8   : > { %3072 = vtanh.f32 %v2173_v41 }
 0x2c9   : > { %3074 = vtanh.f32 %v2168_v42 }
 0x2cd   : > { %v2885_v9 = vpop.f32.mrb[50].mxu0 }
 0x2ce   : > { %v2183_v43 = vadd.f32 %v2885_v9, %v3915_v37  ;;  %v2177_v44 = vpop.f32.mrb[51].mxu0 }
 0x2cf   : > { %v2178_v53 = vadd.f32 %v3915_v37, %v2177_v44 }
 0x2d0   : > { %3076 = vtanh.f32 %v2183_v43 }
 0x2d1   : > { %3078 = vtanh.f32 %v2178_v53 }
 0x2d2   : > { %v3073_v46 = vpop.eup %3072 }
 0x2d3   : > { %v3075_v15 = vpop.eup %3074  ;;  %2360 = vst.msk [vmem:[%s3926_s15 + $0x8] sm:$0xff] %vm2358_vm1, %v3073_v46 }
 0x2d4   : > { %2359 = vst.msk [vmem:[%s3926_s15] sm:$0xff] %vm2358_vm1, %v3075_v15 }
 0x2d5   : > { %v2888_v6 = vpop.f32.mrb[52].mxu0 }
 0x2d6   : > { %v2193_v48 = vadd.f32 %v2888_v6, %v3915_v37  ;;  %v2187_v49 = vpop.f32.mrb[53].mxu0 }
 0x2d7   : > { %v2188_v60 = vadd.f32 %v3915_v37, %v2187_v49 }
 0x2d8   : > { %3080 = vtanh.f32 %v2193_v48 }
 0x2d9   : > { %3082 = vtanh.f32 %v2188_v60 }
 0x2da   : > { %v3077_v50 = vpop.eup %3076 }
 0x2db   : > { %v3079_v11 = vpop.eup %3078  ;;  %2362 = vst.msk [vmem:[%s3926_s15 + $0x18] sm:$0xff] %vm2358_vm1, %v3077_v50 }
 0x2dc   : > { %2361 = vst.msk [vmem:[%s3926_s15 + $0x10] sm:$0xff] %vm2358_vm1, %v3079_v11 }
 0x2dd   : > { %v2891_v55 = vpop.f32.mrb[54].mxu0 }
 0x2de   : > { %v2203_v35 = vadd.f32 %v2891_v55, %v3915_v37  ;;  %v2197_v54 = vpop.f32.mrb[55].mxu0 }
 0x2df   : > { %v2198_v56 = vadd.f32 %v3915_v37, %v2197_v54 }
 0x2e0   : > { %3084 = vtanh.f32 %v2203_v35 }
 0x2e1   : > { %3086 = vtanh.f32 %v2198_v56 }
 0x2e2   : > { %v3081_v57 = vpop.eup %3080 }
 0x2e3   : > { %v3083_v58 = vpop.eup %3082  ;;  %2364 = vst.msk [vmem:[%s3926_s15 + $0x28] sm:$0xff] %vm2358_vm1, %v3081_v57 }
 0x2e4   : > { %2363 = vst.msk [vmem:[%s3926_s15 + $0x20] sm:$0xff] %vm2358_vm1, %v3083_v58 }
 0x2e5   : > { %v2894_v21 = vpop.f32.mrb[56].mxu0 }
 0x2e6   : > { %v2213_v59 = vadd.f32 %v2894_v21, %v3915_v37  ;;  %v2207_v16 = vpop.f32.mrb[57].mxu0 }
 0x2e7   : > { %v2208_v10 = vadd.f32 %v3915_v37, %v2207_v16 }
 0x2e8   : > { %3088 = vtanh.f32 %v2213_v59 }
 0x2e9   : > { %3090 = vtanh.f32 %v2208_v10 }
 0x2ea   : > { %v3085_v62 = vpop.eup %3084 }
 0x2eb   : > { %v3087_v27 = vpop.eup %3086  ;;  %2366 = vst.msk [vmem:[%s3926_s15 + $0x38] sm:$0xff] %vm2358_vm1, %v3085_v62 }
 0x2ec   : > { %2365 = vst.msk [vmem:[%s3926_s15 + $0x30] sm:$0xff] %vm2358_vm1, %v3087_v27 }
 0x2ed   : > { %v2897_v28 = vpop.f32.mrb[58].mxu0 }
 0x2ee   : > { %v2223_v63 = vadd.f32 %v2897_v28, %v3915_v37  ;;  %v2217_v1 = vpop.f32.mrb[59].mxu0 }
 0x2ef   : > { %v2218_v2 = vadd.f32 %v3915_v37, %v2217_v1 }
 0x2f0   : > { %3092 = vtanh.f32 %v2223_v63 }
 0x2f1   : > { %3094 = vtanh.f32 %v2218_v2 }
 0x2f2   : > { %v3089_v14 = vpop.eup %3088 }
 0x2f3   : > { %v3091_v34 = vpop.eup %3090  ;;  %2368 = vst.msk [vmem:[%s3926_s15 + $0x48] sm:$0xff] %vm2358_vm1, %v3089_v14 }
 0x2f4   : > { %2367 = vst.msk [vmem:[%s3926_s15 + $0x40] sm:$0xff] %vm2358_vm1, %v3091_v34 }
 0x2f5   : > { %v2900_v4 = vpop.f32.mrb[60].mxu0 }
 0x2f6   : > { %v2233_v7 = vadd.f32 %v2900_v4, %v3915_v37  ;;  %v2227_v8 = vpop.f32.mrb[61].mxu0 }
 0x2f7   : > { %v2228_v12 = vadd.f32 %v3915_v37, %v2227_v8 }
 0x2f8   : > { %3096 = vtanh.f32 %v2233_v7 }
 0x2f9   : > { %3098 = vtanh.f32 %v2228_v12 }
 0x2fa   : > { %v3093_v13 = vpop.eup %3092 }
 0x2fb   : > { %v3095_v17 = vpop.eup %3094  ;;  %2370 = vst.msk [vmem:[%s3926_s15 + $0x58] sm:$0xff] %vm2358_vm1, %v3093_v13 }
 0x2fc   : > { %2369 = vst.msk [vmem:[%s3926_s15 + $0x50] sm:$0xff] %vm2358_vm1, %v3095_v17 }
 0x2fd   : > { %v2903_v33 = vpop.f32.mrb[62].mxu0 }
 0x2fe   : > { %v2243_v61 = vadd.f32 %v2903_v33, %v3915_v37  ;;  %v2237_v18 = vpop.f32.mrb[63].mxu0 }
 0x2ff   : > { %v2238_v19 = vadd.f32 %v3915_v37, %v2237_v18 }
 0x300   : > { %3100 = vtanh.f32 %v2243_v61 }
 0x301   : > { %3102 = vtanh.f32 %v2238_v19 }
 0x302   : > { %v3097_v23 = vpop.eup %3096 }
 0x303   : > { %v3099_v39 = vpop.eup %3098  ;;  %2372 = vst.msk [vmem:[%s3926_s15 + $0x68] sm:$0xff] %vm2358_vm1, %v3097_v23 }
 0x304   : > { %2371 = vst.msk [vmem:[%s3926_s15 + $0x60] sm:$0xff] %vm2358_vm1, %v3099_v39 }
 0x305   : > { %v2906_v20 = vpop.f32.mrb[64].mxu0 }
 0x306   : > { %v2253_v0 = vadd.f32 %v2906_v20, %v3915_v37  ;;  %v2247_v40 = vpop.f32.mrb[65].mxu0 }
 0x307   : > { %v2248_v25 = vadd.f32 %v3915_v37, %v2247_v40 }
 0x308   : > { %3104 = vtanh.f32 %v2253_v0 }
 0x309   : > { %3106 = vtanh.f32 %v2248_v25 }
 0x30a   : > { %v3101_v22 = vpop.eup %3100 }
 0x30b   : > { %v3103_v24 = vpop.eup %3102  ;;  %2374 = vst.msk [vmem:[%s3926_s15 + $0x78] sm:$0xff] %vm2358_vm1, %v3101_v22 }
 0x30c   : > { %2373 = vst.msk [vmem:[%s3926_s15 + $0x70] sm:$0xff] %vm2358_vm1, %v3103_v24 }
 0x30d   : > { %v2909_v47 = vpop.f32.mrb[66].mxu0 }
 0x30e   : > { %v2263_v5 = vadd.f32 %v2909_v47, %v3915_v37  ;;  %v2257_v26 = vpop.f32.mrb[67].mxu0 }
 0x30f   : > { %v2258_v36 = vadd.f32 %v3915_v37, %v2257_v26 }
 0x310   : > { %3108 = vtanh.f32 %v2263_v5 }
 0x311   : > { %3110 = vtanh.f32 %v2258_v36 }
 0x312   : > { %v3105_v45 = vpop.eup %3104 }
 0x313   : > { %v3107_v29 = vpop.eup %3106  ;;  %2376 = vst.msk [vmem:[%s3926_s15 + $0x88] sm:$0xff] %vm2358_vm1, %v3105_v45 }
 0x314   : > { %2375 = vst.msk [vmem:[%s3926_s15 + $0x80] sm:$0xff] %vm2358_vm1, %v3107_v29 }
 0x315   : > { %v2912_v30 = vpop.f32.mrb[68].mxu0 }
 0x316   : > { %v2273_v31 = vadd.f32 %v2912_v30, %v3915_v37  ;;  %v2267_v52 = vpop.f32.mrb[69].mxu0 }
 0x317   : > { %v2268_v51 = vadd.f32 %v3915_v37, %v2267_v52 }
 0x318   : > { %3112 = vtanh.f32 %v2273_v31 }
 0x319   : > { %3114 = vtanh.f32 %v2268_v51 }
 0x31a   : > { %v3109_v32 = vpop.eup %3108 }
 0x31b   : > { %v3111_v38 = vpop.eup %3110  ;;  %2378 = vst.msk [vmem:[%s3926_s15 + $0x98] sm:$0xff] %vm2358_vm1, %v3109_v32 }
 0x31c   : > { %2377 = vst.msk [vmem:[%s3926_s15 + $0x90] sm:$0xff] %vm2358_vm1, %v3111_v38 }
 0x31d   : > { %v2915_v41 = vpop.f32.mrb[70].mxu0 }
 0x31e   : > { %v2283_v3 = vadd.f32 %v2915_v41, %v3915_v37  ;;  %v2277_v42 = vpop.f32.mrb[71].mxu0 }
 0x31f   : > { %v2278_v9 = vadd.f32 %v3915_v37, %v2277_v42 }
 0x320   : > { %3116 = vtanh.f32 %v2283_v3 }
 0x321   : > { %3118 = vtanh.f32 %v2278_v9 }
 0x322   : > { %v3113_v43 = vpop.eup %3112 }
 0x323   : > { %v3115_v44 = vpop.eup %3114  ;;  %2380 = vst.msk [vmem:[%s3926_s15 + $0xa8] sm:$0xff] %vm2358_vm1, %v3113_v43 }
 0x324   : > { %2379 = vst.msk [vmem:[%s3926_s15 + $0xa0] sm:$0xff] %vm2358_vm1, %v3115_v44 }
 0x325   : > { %v2918_v53 = vpop.f32.mrb[72].mxu0 }
 0x326   : > { %v2293_v46 = vadd.f32 %v2918_v53, %v3915_v37  ;;  %v2287_v15 = vpop.f32.mrb[73].mxu0 }
 0x327   : > { %v2288_v6 = vadd.f32 %v3915_v37, %v2287_v15 }
 0x328   : > { %3120 = vtanh.f32 %v2293_v46 }
 0x329   : > { %3122 = vtanh.f32 %v2288_v6 }
 0x32a   : > { %v3117_v48 = vpop.eup %3116 }
 0x32b   : > { %v3119_v49 = vpop.eup %3118  ;;  %2382 = vst.msk [vmem:[%s3926_s15 + $0xb8] sm:$0xff] %vm2358_vm1, %v3117_v48 }
 0x32c   : > { %2381 = vst.msk [vmem:[%s3926_s15 + $0xb0] sm:$0xff] %vm2358_vm1, %v3119_v49 }
 0x32d   : > { %v2921_v60 = vpop.f32.mrb[74].mxu0 }
 0x32e   : > { %v2303_v50 = vadd.f32 %v2921_v60, %v3915_v37  ;;  %v2297_v11 = vpop.f32.mrb[75].mxu0 }
 0x32f   : > { %v2298_v55 = vadd.f32 %v3915_v37, %v2297_v11 }
 0x330   : > { %3124 = vtanh.f32 %v2303_v50 }
 0x331   : > { %3126 = vtanh.f32 %v2298_v55 }
 0x332   : > { %v3121_v35 = vpop.eup %3120 }
 0x333   : > { %v3123_v54 = vpop.eup %3122  ;;  %2384 = vst.msk [vmem:[%s3926_s15 + $0xc8] sm:$0xff] %vm2358_vm1, %v3121_v35 }
 0x334   : > { %2383 = vst.msk [vmem:[%s3926_s15 + $0xc0] sm:$0xff] %vm2358_vm1, %v3123_v54 }
 0x335   : > { %v2924_v56 = vpop.f32.mrb[76].mxu0 }
 0x336   : > { %v2313_v57 = vadd.f32 %v2924_v56, %v3915_v37  ;;  %v2307_v58 = vpop.f32.mrb[77].mxu0 }
 0x337   : > { %v2308_v21 = vadd.f32 %v3915_v37, %v2307_v58 }
 0x338   : > { %3128 = vtanh.f32 %v2313_v57 }
 0x339   : > { %3130 = vtanh.f32 %v2308_v21 }
 0x33a   : > { %v3125_v59 = vpop.eup %3124 }
 0x33b   : > { %v3127_v16 = vpop.eup %3126  ;;  %2386 = vst.msk [vmem:[%s3926_s15 + $0xd8] sm:$0xff] %vm2358_vm1, %v3125_v59 }
 0x33c   : > { %2385 = vst.msk [vmem:[%s3926_s15 + $0xd0] sm:$0xff] %vm2358_vm1, %v3127_v16 }
 0x33d   : > { %v2927_v10 = vpop.f32.mrb[78].mxu0 }
 0x33e   : > { %v2323_v62 = vadd.f32 %v2927_v10, %v3915_v37  ;;  %v2317_v27 = vpop.f32.mrb[79].mxu0 }
 0x33f   : > { %v2318_v28 = vadd.f32 %v3915_v37, %v2317_v27 }
 0x340   : > { %3132 = vtanh.f32 %v2323_v62 }
 0x341   : > { %3134 = vtanh.f32 %v2318_v28 }
 0x342   : > { %v3129_v63 = vpop.eup %3128 }
 0x343   : > { %v3131_v1 = vpop.eup %3130  ;;  %2388 = vst.msk [vmem:[%s3926_s15 + $0xe8] sm:$0xff] %vm2358_vm1, %v3129_v63 }
 0x344   : > { %2387 = vst.msk [vmem:[%s3926_s15 + $0xe0] sm:$0xff] %vm2358_vm1, %v3131_v1 }
 0x34a   : > { %v3133_v2 = vpop.eup %3132 }
 0x34b   : > { %v3135_v14 = vpop.eup %3134  ;;  %2390 = vst.msk [vmem:[%s3926_s15 + $0xf8] sm:$0xff] %vm2358_vm1, %v3133_v2 }
 0x34c   : > { %2389 = vst.msk [vmem:[%s3926_s15 + $0xf0] sm:$0xff] %vm2358_vm1, %v3135_v14 }
 0x34d PF: > { %s16_s23 = sadd.s32 1, %s3158_s23   ;;  %s4036_s21 = smov %s3154_s22 }
 0x34e   : > { %p13_p5 = scmp.ge.s32.totalorder %s16_s23, 4   ;;  %s4037_s22 = smov %s4039_s24 }
 0x350   :  { %15 = sbr.rel (!%p13_p5) target bundleno = 2 (0x2), region = 91 }

</bundles_post_ra>
